<compile_context>
chip_gen: v7x
topology: tpu7x:2x2x1
jax: 0.10.0
libtpu: 0.0.40
codegen_flags: <defaults>
</compile_context>

<pallas_src>
import functools

import jax
import jax.numpy as jnp
from jax.experimental import pallas as pl
from jax.experimental.pallas import tpu as pltpu

MAX_TB = 2048  # batch tile cap (activations at TB=2048 stay well under scoped VMEM)


def _tpu_kind():
    try:
        return jax.devices()[0].device_kind.lower()
    except Exception:
        return ""


_KIND = _tpu_kind()
# v2-v5 have no bf16 VALU -> keep f32 elementwise there (they are MXU-bound anyway).
_ACT_DTYPE = jnp.float32 if any(t in _KIND for t in ("v2", "v3", "v4", "v5")) else jnp.bfloat16
# Multi-TensorCore chips (v7x and later) need >=2 grid steps for ("parallel",) to
# shard the batch axis across cores; single-core chips keep the minimal grid.
_MIN_GRID_STEPS = 1 if any(t in _KIND for t in ("v2", "v3", "v4", "v5", "v6")) else 2


def _round_up(v, m):
    return ((v + m - 1) // m) * m


def _forward_kernel(x_ref,
                    w1, b1, w2, b2,                # fused encoders (block-diagonal)
                    rw1, rb1, rw2, rb2,            # res blocks 1-2
                    rw3, rb3, rw4, rb4,            # res blocks 3-4
                    pw1, pb1, pw2, pb2,            # post block
                    out_ref, *, act_dtype):
    f32, bf16 = jnp.float32, jnp.bfloat16

    def lrelu(v):
        # leaky_relu(negative_slope=0.01): for v<0, 0.01*v > v, so max picks 0.01*v.
        return jnp.maximum(v, 0.01 * v)

    x = x_ref[...].astype(bf16)                               # (TB, 8), lanes 5:8 are 0

    # --- fused encoders, first layer: one K=8 MXU matmul with a block-diagonal
    #     (8, 64) bf16 weight (lanes 0:32 = encoding3to64 L1, 32:64 = encoding2to64 L1).
    h = jnp.dot(x, w1[...], preferred_element_type=f32) + b1[...]
    h = lrelu(h).astype(act_dtype)                            # (TB, 64)

    # --- fused encoders, second layer: K=64 MXU matmul with a block-diagonal
    #     (64, 256) weight produces out1 = concat(enc3to64, enc2to64) directly.
    o = jnp.dot(h.astype(bf16), w2[...],
                preferred_element_type=f32).astype(act_dtype)
    out1 = lrelu(o + b2[...])                                 # (TB, 256), act_dtype

    # --- 4 x ResBlock256: h = leaky_relu(h + Linear(h)). bf16 into the MXU,
    #     f32 accumulate, elementwise chain in act_dtype (bf16 on v6e/v7x).
    hres = out1
    for rw, rb in ((rw1, rb1), (rw2, rb2), (rw3, rb3), (rw4, rb4)):
        y = jnp.dot(hres.astype(bf16), rw[...],
                    preferred_element_type=f32).astype(act_dtype) + rb[...]
        t = hres + y
        hres = lrelu(t)

    # --- post block on (out1 + out2): small tensors, keep f32 after the dots.
    z = out1 + hres
    p = jnp.dot(z.astype(bf16), pw1[...], preferred_element_type=f32) + pb1[...]
    p = lrelu(p)                                              # (TB, 64), f32
    logits = jnp.dot(p.astype(bf16), pw2[...],
                     preferred_element_type=f32) + pb2[...]   # (TB, 2), f32
    out_ref[...] = jax.nn.sigmoid(logits)


def init_params(key):
    """Deterministic synthetic parameters. Weights stored as [in, out], f32."""
    ks = jax.random.split(key, 32)
    k = iter(ks)

    def w(shape, scale=0.1):
        return (scale * jax.random.normal(next(k), shape)).astype(jnp.float32)

    return {
        # encoding3to64
        "w1a": w((3, 32)), "b1a": w((32,)),
        "w2a": w((32, 128)), "b2a": w((128,)),
        # encoding2to64
        "w1b": w((2, 32)), "b1b": w((32,)),
        "w2b": w((32, 128)), "b2b": w((128,)),
        # res blocks
        "rw1": w((256, 256)), "rb1": w((256,)),
        "rw2": w((256, 256)), "rb2": w((256,)),
        "rw3": w((256, 256)), "rb3": w((256,)),
        "rw4": w((256, 256)), "rb4": w((256,)),
        # post block
        "pw1": w((256, 64)), "pb1": w((64,)),
        "pw2": w((64, 2)), "pb2": w((2,)),
    }


def _pack_params(raw, act_dtype=_ACT_DTYPE):
    """Fuse the two encoders into block-diagonal weights; MXU weights -> bf16.

    Biases that feed the hot (TB,256) elementwise chain (b2, rb1..rb4) are stored
    in act_dtype so the bf16 path never promotes back to f32.
    """
    f32, bf16 = jnp.float32, jnp.bfloat16

    # First encoder layer: block-diag (8, 64) bf16 (rows 5:8 zero; input x is
    # lane-padded 5 -> 8 with zeros, so the padding never contributes).
    w1 = jnp.zeros((8, 64), f32)
    w1 = w1.at[0:3, 0:32].set(raw["w1a"]).at[3:5, 32:64].set(raw["w1b"])
    w1 = w1.astype(bf16)
    b1 = jnp.concatenate([raw["b1a"], raw["b1b"]]).reshape(1, 64)          # f32

    # Second encoder layer: block-diag (64, 256), bf16 for the MXU.
    w2 = jnp.zeros((64, 256), f32)
    w2 = w2.at[0:32, 0:128].set(raw["w2a"]).at[32:64, 128:256].set(raw["w2b"])
    w2 = w2.astype(bf16)
    b2 = jnp.concatenate([raw["b2a"], raw["b2b"]]).reshape(1, 256).astype(act_dtype)

    params = [w1, b1, w2, b2]
    for i in range(1, 5):
        params += [raw[f"rw{i}"].astype(bf16),
                   raw[f"rb{i}"].reshape(1, -1).astype(act_dtype)]
    params += [raw["pw1"].astype(bf16), raw["pb1"].reshape(1, -1),
               raw["pw2"].astype(bf16), raw["pb2"].reshape(1, -1)]
    return params


@jax.jit
def forward(x, *packed_params):
    B = x.shape[0]
    # Padding-aware tile choice: as few grid steps as possible (>=2 only on
    # multi-core chips), TB just big enough to cover B -> minimal dead rows.
    n_steps = max(-(-B // MAX_TB), _MIN_GRID_STEPS if B > 8 else 1)
    TB = _round_up(-(-B // n_steps), 8)
    Bp = n_steps * TB

    # Batch pad to Bp rows and lane pad 5 -> 8 (zeros; matches the (8,64) w1).
    x = jnp.pad(x, ((0, Bp - B), (0, 8 - x.shape[1])))

    flops_per_row = 2 * (8 * 64 + 64 * 256 + 4 * 256 * 256 + 256 * 64 + 64 * 2)
    param_bytes = sum(int(p.size) * p.dtype.itemsize for p in packed_params)
    cost = pl.CostEstimate(
        flops=Bp * flops_per_row,
        transcendentals=Bp * 2,
        bytes_accessed=Bp * 8 * 4 + Bp * 2 * 4 + param_bytes,
    )

    kernel = functools.partial(_forward_kernel, act_dtype=_ACT_DTYPE)

    out = pl.pallas_call(
        kernel,
        out_shape=jax.ShapeDtypeStruct((Bp, 2), jnp.float32),
        grid_spec=pltpu.PrefetchScalarGridSpec(
            num_scalar_prefetch=0,
            grid=(n_steps,),
            in_specs=[pl.BlockSpec((TB, 8), lambda i: (i, 0))]
                     + [pl.BlockSpec(p.shape, lambda i: (0, 0))
                        for p in packed_params],
            # Dense (TB, 2) output block: last dim equals the full array extent, so
            # the (8,128) divisibility rule is satisfied and writeback is 8 B/row.
            out_specs=pl.BlockSpec((TB, 2), lambda i: (i, 0)),
        ),
        compiler_params=pltpu.CompilerParams(
            dimension_semantics=("parallel",)),
        cost_estimate=cost,
    )(x, *packed_params)

    return out[:B]


def ref_forward(x, raw):
    """Pure-JAX f32 reference matching the PyTorch module semantics."""
    def _lrelu(v):
        return jnp.where(v > 0, v, 0.01 * v)

    o = x[:, 0:3]
    d = x[:, 3:5]
    h1 = _lrelu(o @ raw["w1a"] + raw["b1a"])
    e1 = _lrelu(h1 @ raw["w2a"] + raw["b2a"])
    h2 = _lrelu(d @ raw["w1b"] + raw["b1b"])
    e2 = _lrelu(h2 @ raw["w2b"] + raw["b2b"])
    out1 = jnp.concatenate([e1, e2], axis=-1)
    h = out1
    for i in range(1, 5):
        y = h @ raw[f"rw{i}"] + raw[f"rb{i}"]
        h = _lrelu(h + y)
    z = out1 + h
    p = _lrelu(z @ raw["pw1"] + raw["pb1"])
    return jax.nn.sigmoid(p @ raw["pw2"] + raw["pb2"])


if __name__ == "__main__":
    key = jax.random.PRNGKey(0)
    kx, kp = jax.random.split(key)

    # B=300: exercises batch padding (300 -> 304 on single-core chips, 304/2-step
    # on multi-core chips) without triggering the MAX_TB multi-step path.
    B = 300
    x = jax.random.normal(kx, (B, 5), dtype=jnp.float32)  # [:,0:3]=origin, [:,3:5]=direction

    raw = init_params(kp)
    packed = _pack_params(raw)

    y = forward(x, *packed)
    y = jax.block_until_ready(y)

    y_ref = ref_forward(x, raw)
    assert y.shape == (B, 2), y.shape
    # bf16 weights at the MXU boundary (and bf16 elementwise chain on v6e/v7x)
    # -> relaxed tolerance vs. the f32 reference.
    max_err = float(jnp.max(jnp.abs(y - y_ref)))
    assert jnp.allclose(y, y_ref, atol=2e-2, rtol=0), max_err

    print("KERNEL_OK")
</pallas_src>

<mosaic_0001>
module attributes {stable_mosaic.version = 11 : i64} {
  func.func @_forward_kernel(%arg0: i32, %arg1: memref<152x8xf32, #tpu.memory_space<vmem>>, %arg2: memref<8x64xbf16, #tpu.memory_space<vmem>>, %arg3: memref<1x64xf32, #tpu.memory_space<vmem>>, %arg4: memref<64x256xbf16, #tpu.memory_space<vmem>>, %arg5: memref<1x256xbf16, #tpu.memory_space<vmem>>, %arg6: memref<256x256xbf16, #tpu.memory_space<vmem>>, %arg7: memref<1x256xbf16, #tpu.memory_space<vmem>>, %arg8: memref<256x256xbf16, #tpu.memory_space<vmem>>, %arg9: memref<1x256xbf16, #tpu.memory_space<vmem>>, %arg10: memref<256x256xbf16, #tpu.memory_space<vmem>>, %arg11: memref<1x256xbf16, #tpu.memory_space<vmem>>, %arg12: memref<256x256xbf16, #tpu.memory_space<vmem>>, %arg13: memref<1x256xbf16, #tpu.memory_space<vmem>>, %arg14: memref<256x64xbf16, #tpu.memory_space<vmem>>, %arg15: memref<1x64xf32, #tpu.memory_space<vmem>>, %arg16: memref<64x2xbf16, #tpu.memory_space<vmem>>, %arg17: memref<1x2xf32, #tpu.memory_space<vmem>>, %arg18: memref<152x2xf32, #tpu.memory_space<vmem>>) attributes {dimension_semantics = [#tpu.dimension_semantics<parallel>], iteration_bounds = array<i64: 2>, scalar_prefetch = 0 : i64, scratch_operands = 0 : i64, tpu.core_type = #tpu.core_type<tc>, window_params = [{transform_indices = @transform_0, window_bounds = array<i64: 152, 8>}, {pipeline_mode = #tpu.pipeline_mode<synchronous>, transform_indices = @transform_1, window_bounds = array<i64: 8, 64>}, {pipeline_mode = #tpu.pipeline_mode<synchronous>, transform_indices = @transform_2, window_bounds = array<i64: 1, 64>}, {pipeline_mode = #tpu.pipeline_mode<synchronous>, transform_indices = @transform_3, window_bounds = array<i64: 64, 256>}, {pipeline_mode = #tpu.pipeline_mode<synchronous>, transform_indices = @transform_4, window_bounds = array<i64: 1, 256>}, {pipeline_mode = #tpu.pipeline_mode<synchronous>, transform_indices = @transform_5, window_bounds = array<i64: 256, 256>}, {pipeline_mode = #tpu.pipeline_mode<synchronous>, transform_indices = @transform_6, window_bounds = array<i64: 1, 256>}, {pipeline_mode = #tpu.pipeline_mode<synchronous>, transform_indices = @transform_7, window_bounds = array<i64: 256, 256>}, {pipeline_mode = #tpu.pipeline_mode<synchronous>, transform_indices = @transform_8, window_bounds = array<i64: 1, 256>}, {pipeline_mode = #tpu.pipeline_mode<synchronous>, transform_indices = @transform_9, window_bounds = array<i64: 256, 256>}, {pipeline_mode = #tpu.pipeline_mode<synchronous>, transform_indices = @transform_10, window_bounds = array<i64: 1, 256>}, {pipeline_mode = #tpu.pipeline_mode<synchronous>, transform_indices = @transform_11, window_bounds = array<i64: 256, 256>}, {pipeline_mode = #tpu.pipeline_mode<synchronous>, transform_indices = @transform_12, window_bounds = array<i64: 1, 256>}, {pipeline_mode = #tpu.pipeline_mode<synchronous>, transform_indices = @transform_13, window_bounds = array<i64: 256, 64>}, {pipeline_mode = #tpu.pipeline_mode<synchronous>, transform_indices = @transform_14, window_bounds = array<i64: 1, 64>}, {pipeline_mode = #tpu.pipeline_mode<synchronous>, transform_indices = @transform_15, window_bounds = array<i64: 64, 2>}, {pipeline_mode = #tpu.pipeline_mode<synchronous>, transform_indices = @transform_16, window_bounds = array<i64: 1, 2>}, {transform_indices = @transform_17, window_bounds = array<i64: 152, 2>}]} {
    %c0 = arith.constant 0 : index
    %c0_0 = arith.constant 0 : index
    %0 = vector.load %arg1[%c0, %c0_0] : memref<152x8xf32, #tpu.memory_space<vmem>>, vector<152x8xf32>
    %1 = arith.truncf %0 : vector<152x8xf32> to vector<152x8xbf16>
    %c0_1 = arith.constant 0 : index
    %c0_2 = arith.constant 0 : index
    %2 = vector.load %arg2[%c0_1, %c0_2] : memref<8x64xbf16, #tpu.memory_space<vmem>>, vector<8x64xbf16>
    %cst = arith.constant dense<0.000000e+00> : vector<152x64xf32>
    %3 = tpu.matmul %1, %2, %cst {dimension_numbers = #tpu.dot_dimension_numbers<[1], [0], [0], [1], [0, 0, 1, 1], [], []>} : vector<152x8xbf16>, vector<8x64xbf16>, vector<152x64xf32> -> vector<152x64xf32>
    %c0_3 = arith.constant 0 : index
    %c0_4 = arith.constant 0 : index
    %4 = vector.load %arg3[%c0_3, %c0_4] : memref<1x64xf32, #tpu.memory_space<vmem>>, vector<1x64xf32>
    %5 = vector.broadcast %4 : vector<1x64xf32> to vector<152x64xf32>
    %6 = arith.addf %3, %5 : vector<152x64xf32>
    %cst_5 = arith.constant 0.00999999977 : f32
    %7 = vector.broadcast %cst_5 : f32 to vector<152x64xf32>
    %8 = arith.mulf %7, %6 : vector<152x64xf32>
    %9 = arith.maximumf %6, %8 : vector<152x64xf32>
    %10 = arith.truncf %9 : vector<152x64xf32> to vector<152x64xbf16>
    %c0_6 = arith.constant 0 : index
    %c0_7 = arith.constant 0 : index
    %11 = vector.load %arg4[%c0_6, %c0_7] : memref<64x256xbf16, #tpu.memory_space<vmem>>, vector<64x256xbf16>
    %cst_8 = arith.constant dense<0.000000e+00> : vector<152x256xf32>
    %12 = tpu.matmul %10, %11, %cst_8 {dimension_numbers = #tpu.dot_dimension_numbers<[1], [0], [0], [1], [0, 0, 1, 1], [], []>} : vector<152x64xbf16>, vector<64x256xbf16>, vector<152x256xf32> -> vector<152x256xf32>
    %13 = arith.truncf %12 : vector<152x256xf32> to vector<152x256xbf16>
    %c0_9 = arith.constant 0 : index
    %c0_10 = arith.constant 0 : index
    %14 = vector.load %arg5[%c0_9, %c0_10] : memref<1x256xbf16, #tpu.memory_space<vmem>>, vector<1x256xbf16>
    %15 = vector.broadcast %14 : vector<1x256xbf16> to vector<152x256xbf16>
    %16 = arith.addf %13, %15 : vector<152x256xbf16>
    %cst_11 = arith.constant 1.000980e-02 : bf16
    %17 = vector.broadcast %cst_11 : bf16 to vector<152x256xbf16>
    %18 = arith.mulf %17, %16 : vector<152x256xbf16>
    %19 = arith.maximumf %16, %18 : vector<152x256xbf16>
    %c0_12 = arith.constant 0 : index
    %c0_13 = arith.constant 0 : index
    %20 = vector.load %arg6[%c0_12, %c0_13] : memref<256x256xbf16, #tpu.memory_space<vmem>>, vector<256x256xbf16>
    %cst_14 = arith.constant dense<0.000000e+00> : vector<152x256xf32>
    %21 = tpu.matmul %19, %20, %cst_14 {dimension_numbers = #tpu.dot_dimension_numbers<[1], [0], [0], [1], [0, 0, 1, 1], [], []>} : vector<152x256xbf16>, vector<256x256xbf16>, vector<152x256xf32> -> vector<152x256xf32>
    %22 = arith.truncf %21 : vector<152x256xf32> to vector<152x256xbf16>
    %c0_15 = arith.constant 0 : index
    %c0_16 = arith.constant 0 : index
    %23 = vector.load %arg7[%c0_15, %c0_16] : memref<1x256xbf16, #tpu.memory_space<vmem>>, vector<1x256xbf16>
    %24 = vector.broadcast %23 : vector<1x256xbf16> to vector<152x256xbf16>
    %25 = arith.addf %22, %24 : vector<152x256xbf16>
    %26 = arith.addf %19, %25 : vector<152x256xbf16>
    %cst_17 = arith.constant 1.000980e-02 : bf16
    %27 = vector.broadcast %cst_17 : bf16 to vector<152x256xbf16>
    %28 = arith.mulf %27, %26 : vector<152x256xbf16>
    %29 = arith.maximumf %26, %28 : vector<152x256xbf16>
    %c0_18 = arith.constant 0 : index
    %c0_19 = arith.constant 0 : index
    %30 = vector.load %arg8[%c0_18, %c0_19] : memref<256x256xbf16, #tpu.memory_space<vmem>>, vector<256x256xbf16>
    %cst_20 = arith.constant dense<0.000000e+00> : vector<152x256xf32>
    %31 = tpu.matmul %29, %30, %cst_20 {dimension_numbers = #tpu.dot_dimension_numbers<[1], [0], [0], [1], [0, 0, 1, 1], [], []>} : vector<152x256xbf16>, vector<256x256xbf16>, vector<152x256xf32> -> vector<152x256xf32>
    %32 = arith.truncf %31 : vector<152x256xf32> to vector<152x256xbf16>
    %c0_21 = arith.constant 0 : index
    %c0_22 = arith.constant 0 : index
    %33 = vector.load %arg9[%c0_21, %c0_22] : memref<1x256xbf16, #tpu.memory_space<vmem>>, vector<1x256xbf16>
    %34 = vector.broadcast %33 : vector<1x256xbf16> to vector<152x256xbf16>
    %35 = arith.addf %32, %34 : vector<152x256xbf16>
    %36 = arith.addf %29, %35 : vector<152x256xbf16>
    %cst_23 = arith.constant 1.000980e-02 : bf16
    %37 = vector.broadcast %cst_23 : bf16 to vector<152x256xbf16>
    %38 = arith.mulf %37, %36 : vector<152x256xbf16>
    %39 = arith.maximumf %36, %38 : vector<152x256xbf16>
    %c0_24 = arith.constant 0 : index
    %c0_25 = arith.constant 0 : index
    %40 = vector.load %arg10[%c0_24, %c0_25] : memref<256x256xbf16, #tpu.memory_space<vmem>>, vector<256x256xbf16>
    %cst_26 = arith.constant dense<0.000000e+00> : vector<152x256xf32>
    %41 = tpu.matmul %39, %40, %cst_26 {dimension_numbers = #tpu.dot_dimension_numbers<[1], [0], [0], [1], [0, 0, 1, 1], [], []>} : vector<152x256xbf16>, vector<256x256xbf16>, vector<152x256xf32> -> vector<152x256xf32>
    %42 = arith.truncf %41 : vector<152x256xf32> to vector<152x256xbf16>
    %c0_27 = arith.constant 0 : index
    %c0_28 = arith.constant 0 : index
    %43 = vector.load %arg11[%c0_27, %c0_28] : memref<1x256xbf16, #tpu.memory_space<vmem>>, vector<1x256xbf16>
    %44 = vector.broadcast %43 : vector<1x256xbf16> to vector<152x256xbf16>
    %45 = arith.addf %42, %44 : vector<152x256xbf16>
    %46 = arith.addf %39, %45 : vector<152x256xbf16>
    %cst_29 = arith.constant 1.000980e-02 : bf16
    %47 = vector.broadcast %cst_29 : bf16 to vector<152x256xbf16>
    %48 = arith.mulf %47, %46 : vector<152x256xbf16>
    %49 = arith.maximumf %46, %48 : vector<152x256xbf16>
    %c0_30 = arith.constant 0 : index
    %c0_31 = arith.constant 0 : index
    %50 = vector.load %arg12[%c0_30, %c0_31] : memref<256x256xbf16, #tpu.memory_space<vmem>>, vector<256x256xbf16>
    %cst_32 = arith.constant dense<0.000000e+00> : vector<152x256xf32>
    %51 = tpu.matmul %49, %50, %cst_32 {dimension_numbers = #tpu.dot_dimension_numbers<[1], [0], [0], [1], [0, 0, 1, 1], [], []>} : vector<152x256xbf16>, vector<256x256xbf16>, vector<152x256xf32> -> vector<152x256xf32>
    %52 = arith.truncf %51 : vector<152x256xf32> to vector<152x256xbf16>
    %c0_33 = arith.constant 0 : index
    %c0_34 = arith.constant 0 : index
    %53 = vector.load %arg13[%c0_33, %c0_34] : memref<1x256xbf16, #tpu.memory_space<vmem>>, vector<1x256xbf16>
    %54 = vector.broadcast %53 : vector<1x256xbf16> to vector<152x256xbf16>
    %55 = arith.addf %52, %54 : vector<152x256xbf16>
    %56 = arith.addf %49, %55 : vector<152x256xbf16>
    %cst_35 = arith.constant 1.000980e-02 : bf16
    %57 = vector.broadcast %cst_35 : bf16 to vector<152x256xbf16>
    %58 = arith.mulf %57, %56 : vector<152x256xbf16>
    %59 = arith.maximumf %56, %58 : vector<152x256xbf16>
    %60 = arith.addf %19, %59 : vector<152x256xbf16>
    %c0_36 = arith.constant 0 : index
    %c0_37 = arith.constant 0 : index
    %61 = vector.load %arg14[%c0_36, %c0_37] : memref<256x64xbf16, #tpu.memory_space<vmem>>, vector<256x64xbf16>
    %cst_38 = arith.constant dense<0.000000e+00> : vector<152x64xf32>
    %62 = tpu.matmul %60, %61, %cst_38 {dimension_numbers = #tpu.dot_dimension_numbers<[1], [0], [0], [1], [0, 0, 1, 1], [], []>} : vector<152x256xbf16>, vector<256x64xbf16>, vector<152x64xf32> -> vector<152x64xf32>
    %c0_39 = arith.constant 0 : index
    %c0_40 = arith.constant 0 : index
    %63 = vector.load %arg15[%c0_39, %c0_40] : memref<1x64xf32, #tpu.memory_space<vmem>>, vector<1x64xf32>
    %64 = vector.broadcast %63 : vector<1x64xf32> to vector<152x64xf32>
    %65 = arith.addf %62, %64 : vector<152x64xf32>
    %cst_41 = arith.constant 0.00999999977 : f32
    %66 = vector.broadcast %cst_41 : f32 to vector<152x64xf32>
    %67 = arith.mulf %66, %65 : vector<152x64xf32>
    %68 = arith.maximumf %65, %67 : vector<152x64xf32>
    %69 = arith.truncf %68 : vector<152x64xf32> to vector<152x64xbf16>
    %c0_42 = arith.constant 0 : index
    %c0_43 = arith.constant 0 : index
    %70 = vector.load %arg16[%c0_42, %c0_43] : memref<64x2xbf16, #tpu.memory_space<vmem>>, vector<64x2xbf16>
    %cst_44 = arith.constant dense<0.000000e+00> : vector<152x2xf32>
    %71 = tpu.matmul %69, %70, %cst_44 {dimension_numbers = #tpu.dot_dimension_numbers<[1], [0], [0], [1], [0, 0, 1, 1], [], []>} : vector<152x64xbf16>, vector<64x2xbf16>, vector<152x2xf32> -> vector<152x2xf32>
    %c0_45 = arith.constant 0 : index
    %c0_46 = arith.constant 0 : index
    %72 = vector.load %arg17[%c0_45, %c0_46] : memref<1x2xf32, #tpu.memory_space<vmem>>, vector<1x2xf32>
    %73 = vector.broadcast %72 : vector<1x2xf32> to vector<152x2xf32>
    %74 = arith.addf %71, %73 : vector<152x2xf32>
    %75 = arith.negf %74 : vector<152x2xf32>
    %76 = math.exp %75 : vector<152x2xf32>
    %cst_47 = arith.constant 1.000000e+00 : f32
    %77 = vector.broadcast %cst_47 : f32 to vector<152x2xf32>
    %78 = arith.addf %77, %76 : vector<152x2xf32>
    %79 = arith.divf %77, %78 : vector<152x2xf32>
    %c0_48 = arith.constant 0 : index
    %c0_49 = arith.constant 0 : index
    %80 = vector.load %arg18[%c0_48, %c0_49] : memref<152x2xf32, #tpu.memory_space<vmem>>, vector<152x2xf32>
    tpu.vector_store %arg18[%c0_48, %c0_49], %79 {strides = array<i32>} : memref<152x2xf32, #tpu.memory_space<vmem>>, vector<152x2xf32>,
    return
  }
  func.func @transform_0(%arg0: i32) -> (i32, i32) {
    %c0_i32 = arith.constant 0 : i32
    %c0_i32_0 = arith.constant 0 : i32
    return %arg0, %c0_i32 : i32, i32
  }
  func.func @transform_1(%arg0: i32) -> (i32, i32) {
    %c0_i32 = arith.constant 0 : i32
    %c0_i32_0 = arith.constant 0 : i32
    %c0_i32_1 = arith.constant 0 : i32
    return %c0_i32, %c0_i32_0 : i32, i32
  }
  func.func @transform_2(%arg0: i32) -> (i32, i32) {
    %c0_i32 = arith.constant 0 : i32
    %c0_i32_0 = arith.constant 0 : i32
    %c0_i32_1 = arith.constant 0 : i32
    return %c0_i32, %c0_i32_0 : i32, i32
  }
  func.func @transform_3(%arg0: i32) -> (i32, i32) {
    %c0_i32 = arith.constant 0 : i32
    %c0_i32_0 = arith.constant 0 : i32
    %c0_i32_1 = arith.constant 0 : i32
    return %c0_i32, %c0_i32_0 : i32, i32
  }
  func.func @transform_4(%arg0: i32) -> (i32, i32) {
    %c0_i32 = arith.constant 0 : i32
    %c0_i32_0 = arith.constant 0 : i32
    %c0_i32_1 = arith.constant 0 : i32
    return %c0_i32, %c0_i32_0 : i32, i32
  }
  func.func @transform_5(%arg0: i32) -> (i32, i32) {
    %c0_i32 = arith.constant 0 : i32
    %c0_i32_0 = arith.constant 0 : i32
    %c0_i32_1 = arith.constant 0 : i32
    return %c0_i32, %c0_i32_0 : i32, i32
  }
  func.func @transform_6(%arg0: i32) -> (i32, i32) {
    %c0_i32 = arith.constant 0 : i32
    %c0_i32_0 = arith.constant 0 : i32
    %c0_i32_1 = arith.constant 0 : i32
    return %c0_i32, %c0_i32_0 : i32, i32
  }
  func.func @transform_7(%arg0: i32) -> (i32, i32) {
    %c0_i32 = arith.constant 0 : i32
    %c0_i32_0 = arith.constant 0 : i32
    %c0_i32_1 = arith.constant 0 : i32
    return %c0_i32, %c0_i32_0 : i32, i32
  }
  func.func @transform_8(%arg0: i32) -> (i32, i32) {
    %c0_i32 = arith.constant 0 : i32
    %c0_i32_0 = arith.constant 0 : i32
    %c0_i32_1 = arith.constant 0 : i32
    return %c0_i32, %c0_i32_0 : i32, i32
  }
  func.func @transform_9(%arg0: i32) -> (i32, i32) {
    %c0_i32 = arith.constant 0 : i32
    %c0_i32_0 = arith.constant 0 : i32
    %c0_i32_1 = arith.constant 0 : i32
    return %c0_i32, %c0_i32_0 : i32, i32
  }
  func.func @transform_10(%arg0: i32) -> (i32, i32) {
    %c0_i32 = arith.constant 0 : i32
    %c0_i32_0 = arith.constant 0 : i32
    %c0_i32_1 = arith.constant 0 : i32
    return %c0_i32, %c0_i32_0 : i32, i32
  }
  func.func @transform_11(%arg0: i32) -> (i32, i32) {
    %c0_i32 = arith.constant 0 : i32
    %c0_i32_0 = arith.constant 0 : i32
    %c0_i32_1 = arith.constant 0 : i32
    return %c0_i32, %c0_i32_0 : i32, i32
  }
  func.func @transform_12(%arg0: i32) -> (i32, i32) {
    %c0_i32 = arith.constant 0 : i32
    %c0_i32_0 = arith.constant 0 : i32
    %c0_i32_1 = arith.constant 0 : i32
    return %c0_i32, %c0_i32_0 : i32, i32
  }
  func.func @transform_13(%arg0: i32) -> (i32, i32) {
    %c0_i32 = arith.constant 0 : i32
    %c0_i32_0 = arith.constant 0 : i32
    %c0_i32_1 = arith.constant 0 : i32
    return %c0_i32, %c0_i32_0 : i32, i32
  }
  func.func @transform_14(%arg0: i32) -> (i32, i32) {
    %c0_i32 = arith.constant 0 : i32
    %c0_i32_0 = arith.constant 0 : i32
    %c0_i32_1 = arith.constant 0 : i32
    return %c0_i32, %c0_i32_0 : i32, i32
  }
  func.func @transform_15(%arg0: i32) -> (i32, i32) {
    %c0_i32 = arith.constant 0 : i32
    %c0_i32_0 = arith.constant 0 : i32
    %c0_i32_1 = arith.constant 0 : i32
    return %c0_i32, %c0_i32_0 : i32, i32
  }
  func.func @transform_16(%arg0: i32) -> (i32, i32) {
    %c0_i32 = arith.constant 0 : i32
    %c0_i32_0 = arith.constant 0 : i32
    %c0_i32_1 = arith.constant 0 : i32
    return %c0_i32, %c0_i32_0 : i32, i32
  }
  func.func @transform_17(%arg0: i32) -> (i32, i32) {
    %c0_i32 = arith.constant 0 : i32
    %c0_i32_0 = arith.constant 0 : i32
    return %arg0, %c0_i32 : i32, i32
  }
}

</mosaic_0001>

<bundles_post_ra>
// kernel: forward.1
= control target key start
LH: loop header
LB: loop body
LE: loop exit
PB: predicated region body
PF: predicated region fallthrough
CT: control target
= control target key end

     0   :  { %s4428_s24 = smov 0   ;;  %s5595_s0 = inlined_call_operand.vmem [shape: f32[304,8], index: 0, kind: input, shape index: {}]   ;;  %s5596_s1 = inlined_call_operand.vmem [shape: bf16[8,64], index: 1, kind: input, shape index: {}]   ;;  %s5597_s2 = inlined_call_operand.vmem [shape: f32[1,64], index: 2, kind: input, shape index: {}]   ;;  %s5598_s3 = inlined_call_operand.vmem [shape: bf16[64,256], index: 3, kind: input, shape index: {}]   ;;  %s5599_s4 = inlined_call_operand.vmem [shape: bf16[1,256], index: 4, kind: input, shape index: {}]   ;;  %s5600_s5 = inlined_call_operand.vmem [shape: bf16[256,256], index: 5, kind: input, shape index: {}]   ;;  %s5601_s6 = inlined_call_operand.vmem [shape: bf16[1,256], index: 6, kind: input, shape index: {}]   ;;  %s5602_s7 = inlined_call_operand.vmem [shape: bf16[256,256], index: 7, kind: input, shape index: {}]   ;;  %s5603_s8 = inlined_call_operand.vmem [shape: bf16[1,256], index: 8, kind: input, shape index: {}]   ;;  %s5604_s9 = inlined_call_operand.vmem [shape: bf16[256,256], index: 9, kind: input, shape index: {}]   ;;  %s5605_s10 = inlined_call_operand.vmem [shape: bf16[1,256], index: 10, kind: input, shape index: {}]   ;;  %s5606_s11 = inlined_call_operand.vmem [shape: bf16[256,256], index: 11, kind: input, shape index: {}]   ;;  %s5607_s12 = inlined_call_operand.vmem [shape: bf16[1,256], index: 12, kind: input, shape index: {}]   ;;  %s5608_s13 = inlined_call_operand.vmem [shape: bf16[256,64], index: 13, kind: input, shape index: {}]   ;;  %s5609_s14 = inlined_call_operand.vmem [shape: f32[1,64], index: 14, kind: input, shape index: {}]   ;;  %s5610_s15 = inlined_call_operand.vmem [shape: bf16[64,2], index: 15, kind: input, shape index: {}]   ;;  %s5611_s16 = inlined_call_operand.vmem [shape: f32[1,2], index: 16, kind: input, shape index: {}]   ;;  %s5612_s17 = inlined_call_operand.vmem [shape: f32[304,2], index: 17, kind: output, shape index: {}]  }
   0x1   :  { %5613 = sst [smem:[#allocation2_spill]] %s5595_s0 }
   0x2   :  { %5614 = sst [smem:[#allocation3_spill]] %s5596_s1 }
   0x3 LB: > { %s3644_s25 = sadd.s32 4294967295, %s4334_s24   ;;  %p3648_p0 = scmp.ge.s32.totalorder %s4334_s24, 1  ;;  %s4334_s24 = sphi %s4428_s24, %s27_s24  }
   0x4   : > { %p488_p1 = scmp.lt.s32.totalorder %s4334_s24, 3 }
   0x6   : > { %p489_p2 = pnand %p3648_p0, %p488_p1 }
   0x7   : > { %s5615_s28 = sld [smem:[#allocation3_spill]] (!%p489_p2)  ;;  %vm622_vm0 = vcmask (!%p489_p2), 1043456   ;;  %s540_s29 = smul.u32 (!%p489_p2), 19, %s3644_s25  ;;  %v4028_v2 = vld [vmem:[%s5598_s3 + $0x4] ss:$8 sps:$4 sm:$0xff] (!%p489_p2)   ;;  %vm591_vm1 = vcmask (!%p489_p2), 64512  }
   0x8   : > { %492 = sbr.rel (%p489_p2) target bundleno = 1917 (0x77d), region = 88  ;;  %v4030_v3 = vld [vmem:[%s5598_s3] ss:$8 sps:$4 sm:$0xff] (!%p489_p2)   ;;  %865 = vmatprep.subr.bf16.mxu1 (!%p489_p2), %v4028_v2  ;;  %s5616_s22 = sld [smem:[#allocation2_spill]] (!%p489_p2)  ;;  %v4031_v33 = vld [vmem:[%s5598_s3 + $0x14] ss:$8 sps:$4 sm:$0xff] (!%p489_p2)  }
   0x9   : > { %p541_p3 = scmp.lt.s32.totalorder (!%p489_p2), %s540_s29, 37  ;;  %866 = vmatpush1.bf16.msra.mxu1 (!%p489_p2), %v4030_v3  ;;  %v4033_v34 = vld [vmem:[%s5598_s3 + $0x10] ss:$8 sps:$4 sm:$0xff] (!%p489_p2)   ;;  %v4034_v35 = vld [vmem:[%s5598_s3 + $0x24] ss:$8 sps:$4 sm:$0xff] (!%p489_p2)   ;;  %v4336_v39 = vmov (!%p489_p2), 0  }
   0xa   : > { %867 = vmatprep.subr.bf16.mxu1 (!%p489_p2), %v4031_v33  ;;  %v4036_v36 = vld [vmem:[%s5598_s3 + $0x20] ss:$8 sps:$4 sm:$0xff] (!%p489_p2)   ;;  %v4037_v37 = vld [vmem:[%s5598_s3 + $0x34] ss:$8 sps:$4 sm:$0xff] (!%p489_p2)   ;;  %v4039_v38 = vld [vmem:[%s5598_s3 + $0x30] ss:$8 sps:$4 sm:$0xff] (!%p489_p2)   ;;  %897 = vmatprep.mubr.bf16.mxu1 (!%p489_p2), %v4336_v39 }
   0xb   : > { %v4040_v40 = vld [vmem:[%s5600_s5] ss:$8 sps:$4 sm:$0xff] (!%p489_p2)   ;;  %v4042_v41 = vld [vmem:[%s5600_s5 + $0x4] ss:$8 sps:$4 sm:$0xff] (!%p489_p2)   ;;  %v4045_v42 = vld [vmem:[%s5600_s5 + $0x14] ss:$8 sps:$4 sm:$0xff] (!%p489_p2)  }
   0xc   : > { %v4043_v43 = vld [vmem:[%s5600_s5 + $0x10] ss:$8 sps:$4 sm:$0xff] (!%p489_p2)   ;;  %v4048_v44 = vld [vmem:[%s5600_s5 + $0x24] ss:$8 sps:$4 sm:$0xff] (!%p489_p2)   ;;  %v4046_v45 = vld [vmem:[%s5600_s5 + $0x20] ss:$8 sps:$4 sm:$0xff] (!%p489_p2)  }
   0xd   : > { %v583_v0 = vld [vmem:[%s5615_s28] sm:$0xf] (!%p489_p2)  ;;  %868 = vmatpush1.bf16.msra.mxu1 (!%p489_p2), %v4033_v34  ;;  %v4051_v46 = vld [vmem:[%s5600_s5 + $0x34] ss:$8 sps:$4 sm:$0xff] (!%p489_p2)   ;;  %v4049_v47 = vld [vmem:[%s5600_s5 + $0x30] ss:$8 sps:$4 sm:$0xff] (!%p489_p2)  }
   0xe   : > { %4017 = vmatprep.subr.msk.bf16.mxu0 (!%p489_p2), %vm622_vm0, %v583_v0  ;;  %v624_v1 = vsel (!%p489_p2), %vm622_vm0, %v583_v0, 0  ;;  %869 = vmatprep.subr.bf16.mxu1 (!%p489_p2), %v4034_v35  ;;  %v4054_v48 = vld [vmem:[%s5600_s5 + $0x44] ss:$8 sps:$4 sm:$0xff] (!%p489_p2)   ;;  %v4052_v49 = vld [vmem:[%s5600_s5 + $0x40] ss:$8 sps:$4 sm:$0xff] (!%p489_p2)   ;;  %vm834_vm2 = vcmask (!%p489_p2), 523264  }
   0xf   : > { %3968 = vmatpush3.bf16.msra.mxu0 %v624_v1  ;;  %s5618_s29 = smov (!%p541_p3, %s540_s29), 37  ;;  %v4057_v50 = vld [vmem:[%s5600_s5 + $0x54] ss:$8 sps:$4 sm:$0xff]   ;;  %v4055_v51 = vld [vmem:[%s5600_s5 + $0x50] ss:$8 sps:$4 sm:$0xff]   ;;  %vm3568_vm3 = vcmask 15360  }
  0x10   : > { %s3649_s1 = sshll.u32 %s5618_s29, 3  ;;  %1306 = vmatprep.subr.bf16.mxu0 %v4042_v41  ;;  %v4060_v52 = vld [vmem:[%s5600_s5 + $0x64] ss:$8 sps:$4 sm:$0xff]   ;;  %v4058_v53 = vld [vmem:[%s5600_s5 + $0x60] ss:$8 sps:$4 sm:$0xff]  }
  0x11   : > { %s4453_s23 = scalar_lea.vmem %s5616_s22, %s3649_s1  ;;  %870 = vmatpush1.bf16.msra.mxu1 %v4036_v36  ;;  %v4063_v54 = vld [vmem:[%s5600_s5 + $0x74] ss:$8 sps:$4 sm:$0xff]   ;;  %v4061_v55 = vld [vmem:[%s5600_s5 + $0x70] ss:$8 sps:$4 sm:$0xff]   ;;  %v4066_v56 = vld [vmem:[%s5600_s5 + $0x84] ss:$8 sps:$4 sm:$0xff]   ;;  %s5541_s27 = scalar_lea.vmem %s5612_s17, %s3649_s1 }
  0x12   : > { %v554_v4 = vld [vmem:[%s4453_s23] sm:$0xff]  ;;  %v555_v5 = vld [vmem:[%s4453_s23 + $0x8] sm:$0xff]  ;;  %v556_v6 = vld [vmem:[%s4453_s23 + $0x10] sm:$0xff]  ;;  %871 = vmatprep.subr.bf16.mxu1 %v4037_v37 }
  0x13   : > { %v573_v7 = vpack.c.bf16 %v555_v5, %v554_v4  ;;  %v557_v8 = vld [vmem:[%s4453_s23 + $0x18] sm:$0xff]  ;;  %v558_v9 = vld [vmem:[%s4453_s23 + $0x20] sm:$0xff]  ;;  %v559_v10 = vld [vmem:[%s4453_s23 + $0x28] sm:$0xff] }
  0x14   : > { %v574_v11 = vpack.c.bf16 %v557_v8, %v556_v6  ;;  %v575_v12 = vpack.c.bf16 %v559_v10, %v558_v9  ;;  %v560_v13 = vld [vmem:[%s4453_s23 + $0x30] sm:$0xff]  ;;  %v561_v14 = vld [vmem:[%s4453_s23 + $0x38] sm:$0xff]  ;;  %v562_v15 = vld [vmem:[%s4453_s23 + $0x40] sm:$0xff] }
  0x15   : > { %3969 = vmatprep.mubr.msk.bf16.mxu0 %vm591_vm1, %v573_v7  ;;  %v563_v16 = vld [vmem:[%s4453_s23 + $0x48] sm:$0xff]  ;;  %v576_v17 = vpack.c.bf16 %v561_v14, %v560_v13  ;;  %v564_v19 = vld [vmem:[%s4453_s23 + $0x50] sm:$0xff]  ;;  %v565_v20 = vld [vmem:[%s4453_s23 + $0x58] sm:$0xff]  ;;  %872 = vmatpush1.bf16.msra.mxu1 %v4039_v38 }
  0x16   : > { %3970 = vmatmul.mubr.msk.bf16.vlgmr.msra.gmra.mrb[0].mxu0 %vm591_vm1, %v574_v11  ;;  %v577_v18 = vpack.c.bf16 %v563_v16, %v562_v15  ;;  %v566_v21 = vld [vmem:[%s4453_s23 + $0x60] sm:$0xff]  ;;  %v567_v22 = vld [vmem:[%s4453_s23 + $0x68] sm:$0xff]  ;;  %v578_v23 = vpack.c.bf16 %v565_v20, %v564_v19  ;;  %v568_v25 = vld [vmem:[%s4453_s23 + $0x70] sm:$0xff] }
  0x17   : > { %3973 = vmatprep.mubr.msk.bf16.mxu0 %vm591_vm1, %v575_v12  ;;  %v579_v24 = vpack.c.bf16 %v567_v22, %v566_v21  ;;  %v569_v26 = vld [vmem:[%s4453_s23 + $0x78] sm:$0xff]  ;;  %v570_v27 = vld [vmem:[%s4453_s23 + $0x80] sm:$0xff]  ;;  %v571_v28 = vld [vmem:[%s4453_s23 + $0x88] sm:$0xff]  ;;  %1307 = vmatpush1.bf16.msra.mxu0 %v4040_v40 }
  0x18   : > { %v580_v29 = vpack.c.bf16 %v569_v26, %v568_v25  ;;  %v581_v30 = vpack.c.bf16 %v571_v28, %v570_v27  ;;  %v572_v31 = vld [vmem:[%s4453_s23 + $0x90] sm:$0xff]  ;;  %1308 = vmatprep.subr.bf16.mxu0 %v4045_v42  ;;  %v4064_v57 = vld [vmem:[%s5600_s5 + $0x80] ss:$8 sps:$4 sm:$0xff]   ;;  %v4072_v60 = vld [vmem:[%s5600_s5 + $0xa4] ss:$8 sps:$4 sm:$0xff]  }
  0x19   : > { %v582_v32 = vpack.c.bf16 %v572_v31, %v572_v31  ;;  %v4069_v58 = vld [vmem:[%s5600_s5 + $0x94] ss:$8 sps:$4 sm:$0xff]   ;;  %v4067_v59 = vld [vmem:[%s5600_s5 + $0x90] ss:$8 sps:$4 sm:$0xff]   ;;  %v4070_v61 = vld [vmem:[%s5600_s5 + $0xa0] ss:$8 sps:$4 sm:$0xff]  }
  0x1a   : > { %v4075_v62 = vld [vmem:[%s5600_s5 + $0xb4] ss:$8 sps:$4 sm:$0xff]   ;;  %v4575_v63 = vld [vmem:[%s5597_s2] ss:$0 sm:$0xff]  ;;  %v4073_v0 = vld [vmem:[%s5600_s5 + $0xb0] ss:$8 sps:$4 sm:$0xff]  }
  0x1b   : > { %1309 = vmatpush1.bf16.msra.mxu0 %v4043_v43  ;;  %v4078_v2 = vld [vmem:[%s5600_s5 + $0xc4] ss:$8 sps:$4 sm:$0xff]   ;;  %v4076_v10 = vld [vmem:[%s5600_s5 + $0xc0] ss:$8 sps:$4 sm:$0xff]  }
  0x1c   : > { %1310 = vmatprep.subr.bf16.mxu0 %v4048_v44 }
  0x1e   : > { %3974 = vmatmul.mubr.msk.bf16.gmra.mrb[4].mxu0 %vm591_vm1, %v576_v17 }
  0x1f   : > { %3977 = vmatprep.mubr.msk.bf16.mxu0 %vm591_vm1, %v577_v18  ;;  %1311 = vmatpush1.bf16.msra.mxu0 %v4046_v45 }
  0x20   : > { %1312 = vmatprep.subr.bf16.mxu0 %v4051_v46 }
  0x23   : > { %1313 = vmatpush1.bf16.msra.mxu0 %v4049_v47 }
  0x24   : > { %1314 = vmatprep.subr.bf16.mxu0 %v4054_v48 }
  0x26   : > { %3978 = vmatmul.mubr.msk.bf16.gmra.mrb[8].mxu0 %vm591_vm1, %v578_v23 }
  0x27   : > { %3981 = vmatprep.mubr.msk.bf16.mxu0 %vm591_vm1, %v579_v24  ;;  %1315 = vmatpush1.bf16.msra.mxu0 %v4052_v49 }
  0x28   : > { %1316 = vmatprep.subr.bf16.mxu0 %v4057_v50 }
  0x2b   : > { %1317 = vmatpush1.bf16.msra.mxu0 %v4055_v51 }
  0x2c   : > { %1318 = vmatprep.subr.bf16.mxu0 %v4060_v52 }
  0x2e   : > { %3982 = vmatmul.mubr.msk.bf16.gmra.mrb[12].mxu0 %vm591_vm1, %v580_v29 }
  0x2f   : > { %3985 = vmatprep.mubr.msk.bf16.mxu0 %vm591_vm1, %v581_v30  ;;  %1319 = vmatpush1.bf16.msra.mxu0 %v4058_v53 }
  0x30   : > { %1320 = vmatprep.subr.bf16.mxu0 %v4063_v54 }
  0x33   : > { %1321 = vmatpush1.bf16.msra.mxu0 %v4061_v55 }
  0x34   : > { %1322 = vmatprep.subr.bf16.mxu0 %v4066_v56 }
  0x36   : > { %3986 = vmatmul.mubr.msk.bf16.gmra.mrb[16].mxu0 %vm591_vm1, %v582_v32 }
  0x37   : > { %1323 = vmatpush1.bf16.msra.mxu0 %v4064_v57 }
  0x38   : > { %1324 = vmatprep.subr.bf16.mxu0 %v4069_v58 }
  0x3b   : > { %1325 = vmatpush1.bf16.msra.mxu0 %v4067_v59 }
  0x3c   : > { %1326 = vmatprep.subr.bf16.mxu0 %v4072_v60 }
  0x3f   : > { %1327 = vmatpush1.bf16.msra.mxu0 %v4070_v61 }
  0x40   : > { %1328 = vmatprep.subr.bf16.mxu0 %v4075_v62 }
  0x43   : > { %1329 = vmatpush1.bf16.msra.mxu0 %v4073_v0 }
  0x44   : > { %1330 = vmatprep.subr.bf16.mxu0 %v4078_v2 }
  0x47   : > { %1331 = vmatpush1.bf16.msra.mxu0 %v4076_v10 }
  0xe9   : > { %v3971_v1 = vpop.f32.mrb[0].mxu0 }
  0xea   : > { %v669_v3 = vadd.f32 %v3971_v1, %v4575_v63  ;;  %v660_v4 = vpop.f32.mrb[1].mxu0 }
  0xeb   : > { %v661_v5 = vadd.f32 %v4575_v63, %v660_v4  ;;  %v3972_v6 = vpop.f32.mrb[2].mxu0 }
  0xec   : > { %v740_v7 = vmul.f32 0.01, %v669_v3  ;;  %v672_v8 = vadd.f32 %v3972_v6, %v4575_v63  ;;  %v663_v9 = vpop.f32.mrb[3].mxu0 }
  0xed   : > { %v738_v11 = vmul.f32 0.01, %v661_v5  ;;  %v664_v12 = vadd.f32 %v4575_v63, %v663_v9 }
  0xee   : > { %v741_v13 = vmul.f32 0.01, %v672_v8  ;;  %v759_v15 = vmax.f32 %v669_v3, %v740_v7 }
  0xef   : > { %v739_v14 = vmul.f32 0.01, %v664_v12  ;;  %v757_v17 = vmax.f32 %v661_v5, %v738_v11 }
  0xf0   : > { %v760_v16 = vmax.f32 %v672_v8, %v741_v13 }
  0xf1   : > { %v758_v18 = vmax.f32 %v664_v12, %v739_v14  ;;  %v3975_v19 = vpop.f32.mrb[4].mxu0 }
  0xf2   : > { %v777_v20 = vpack.c.bf16 %v760_v16, %v759_v15  ;;  %v685_v21 = vadd.f32 %v3975_v19, %v4575_v63  ;;  %v676_v22 = vpop.f32.mrb[5].mxu0 }
  0xf3   : > { %v776_v23 = vpack.c.bf16 %v758_v18, %v757_v17  ;;  %v677_v24 = vadd.f32 %v4575_v63, %v676_v22  ;;  %v3976_v25 = vpop.f32.mrb[6].mxu0 }
  0xf4   : > { %v744_v26 = vmul.f32 0.01, %v685_v21  ;;  %v688_v27 = vadd.f32 %v3976_v25, %v4575_v63  ;;  %v679_v28 = vpop.f32.mrb[7].mxu0 }
  0xf5   : > { %v742_v29 = vmul.f32 0.01, %v677_v24  ;;  %3670 = vmatmul.mubr.msk.bf16.vlgmr.msra.gmra.mrb[0].mxu1 %vm834_vm2, %v776_v23  ;;  %v680_v30 = vadd.f32 %v4575_v63, %v679_v28  ;;  %v4079_v28 = vld [vmem:[%s5600_s5 + $0xd0] ss:$8 sps:$4 sm:$0xff]  }
  0xf6   : > { %v763_v31 = vmax.f32 %v685_v21, %v744_v26  ;;  %v745_v32 = vmul.f32 0.01, %v688_v27  ;;  %907 = vmatprep.mubr.bf16.mxu1 %v4336_v39 }
  0xf7   : > { %v761_v33 = vmax.f32 %v677_v24, %v742_v29  ;;  %v743_v34 = vmul.f32 0.01, %v680_v30  ;;  %v4084_v29 = vld [vmem:[%s5600_s5 + $0xe4] ss:$8 sps:$4 sm:$0xff]  }
  0xf8   : > { %v764_v35 = vmax.f32 %v688_v27, %v745_v32  ;;  %v4081_v27 = vld [vmem:[%s5600_s5 + $0xd4] ss:$8 sps:$4 sm:$0xff]   ;;  %v4088_v32 = vld [vmem:[%s5602_s7] ss:$8 sps:$4 sm:$0xff]  }
  0xf9   : > { %v762_v36 = vmax.f32 %v680_v30, %v743_v34  ;;  %v3979_v37 = vpop.f32.mrb[8].mxu0  ;;  %1332 = vmatprep.subr.bf16.mxu0 %v4081_v27  ;;  %v4087_v30 = vld [vmem:[%s5600_s5 + $0xf4] ss:$8 sps:$4 sm:$0xff]  }
  0xfa   : > { %v779_v38 = vpack.c.bf16 %v764_v35, %v763_v31  ;;  %v701_v40 = vadd.f32 %v3979_v37, %v4575_v63  ;;  %v692_v41 = vpop.f32.mrb[9].mxu0  ;;  %1333 = vmatpush1.bf16.msra.mxu0 %v4079_v28  ;;  %v4085_v31 = vld [vmem:[%s5600_s5 + $0xf0] ss:$8 sps:$4 sm:$0xff]   ;;  %v4093_v34 = vld [vmem:[%s5602_s7 + $0x14] ss:$8 sps:$4 sm:$0xff]  }
  0xfb   : > { %v778_v42 = vpack.c.bf16 %v762_v36, %v761_v33  ;;  %v693_v43 = vadd.f32 %v4575_v63, %v692_v41  ;;  %v3980_v44 = vpop.f32.mrb[10].mxu0  ;;  %1334 = vmatprep.subr.bf16.mxu0 %v4084_v29  ;;  %v4090_v33 = vld [vmem:[%s5602_s7 + $0x4] ss:$8 sps:$4 sm:$0xff]   ;;  %v4091_v35 = vld [vmem:[%s5602_s7 + $0x10] ss:$8 sps:$4 sm:$0xff]  }
  0xfc   : > { %v748_v45 = vmul.f32 0.01, %v701_v40  ;;  %v704_v46 = vadd.f32 %v3980_v44, %v4575_v63  ;;  %v695_v47 = vpop.f32.mrb[11].mxu0  ;;  %1767 = vmatprep.subr.bf16.mxu1 %v4090_v33  ;;  %v4096_v36 = vld [vmem:[%s5602_s7 + $0x24] ss:$8 sps:$4 sm:$0xff]  }
  0xfd   : > { %3671 = vmatmul.mubr.msk.bf16.gmra.mrb[4].mxu1 %vm834_vm2, %v777_v20  ;;  %v746_v48 = vmul.f32 0.01, %v693_v43  ;;  %v696_v49 = vadd.f32 %v4575_v63, %v695_v47  ;;  %v4094_v37 = vld [vmem:[%s5602_s7 + $0x20] ss:$8 sps:$4 sm:$0xff]   ;;  %v4102_v41 = vld [vmem:[%s5602_s7 + $0x44] ss:$8 sps:$4 sm:$0xff]  }
  0xfe   : > { %v767_v50 = vmax.f32 %v701_v40, %v748_v45  ;;  %917 = vmatprep.mubr.bf16.mxu1 %v4336_v39  ;;  %v749_v51 = vmul.f32 0.01, %v704_v46  ;;  %1768 = vmatpush1.bf16.msra.mxu1 %v4088_v32  ;;  %v4097_v40 = vld [vmem:[%s5602_s7 + $0x30] ss:$8 sps:$4 sm:$0xff]   ;;  %v4108_v45 = vld [vmem:[%s5602_s7 + $0x64] ss:$8 sps:$4 sm:$0xff]  }
  0xff   : > { %v765_v52 = vmax.f32 %v693_v43, %v746_v48  ;;  %v747_v53 = vmul.f32 0.01, %v696_v49  ;;  %1769 = vmatprep.subr.bf16.mxu1 %v4093_v34  ;;  %v4105_v43 = vld [vmem:[%s5602_s7 + $0x54] ss:$8 sps:$4 sm:$0xff]   ;;  %v4103_v44 = vld [vmem:[%s5602_s7 + $0x50] ss:$8 sps:$4 sm:$0xff]  }
 0x100   : > { %v768_v54 = vmax.f32 %v704_v46, %v749_v51  ;;  %v4106_v46 = vld [vmem:[%s5602_s7 + $0x60] ss:$8 sps:$4 sm:$0xff]   ;;  %v4337_v47 = vmov 1966171168   ;;  %v4109_v51 = vld [vmem:[%s5602_s7 + $0x70] ss:$8 sps:$4 sm:$0xff]  }
 0x101   : > { %v766_v55 = vmax.f32 %v696_v49, %v747_v53  ;;  %v3983_v56 = vpop.f32.mrb[12].mxu0  ;;  %v1027_v48 = vunpack.c.l.s4 %v4337_v47  ;;  %v1029_v49 = vlaneseq }
 0x102   : > { %v781_v57 = vpack.c.bf16 %v768_v54, %v767_v50  ;;  %v717_v58 = vadd.f32 %v3983_v56, %v4575_v63  ;;  %v708_v59 = vpop.f32.mrb[13].mxu0  ;;  %1770 = vmatpush1.bf16.msra.mxu1 %v4091_v35  ;;  %v4111_v50 = vld [vmem:[%s5602_s7 + $0x74] ss:$8 sps:$4 sm:$0xff]   ;;  %v4114_v54 = vld [vmem:[%s5602_s7 + $0x84] ss:$8 sps:$4 sm:$0xff]  }
 0x103   : > { %v780_v60 = vpack.c.bf16 %v766_v55, %v765_v52  ;;  %v709_v61 = vadd.f32 %v4575_v63, %v708_v59  ;;  %v3984_v62 = vpop.f32.mrb[14].mxu0  ;;  %1771 = vmatprep.subr.bf16.mxu1 %v4096_v36  ;;  %v1028_v52 = vunpack.c.0.s8 %v1027_v48  ;;  %v1030_v53 = vshrl.u32 %v1029_v49, 7  ;;  %v3680_v55 = vld.sshfl [vmem:[%s5599_s4] sm:$0x11 pattern:$0x75316420] }
 0x104   : > { %v752_v0 = vmul.f32 0.01, %v717_v58  ;;  %v720_v1 = vadd.f32 %v3984_v62, %v4575_v63  ;;  %v711_v2 = vpop.f32.mrb[15].mxu0  ;;  %v4112_v56 = vld [vmem:[%s5602_s7 + $0x80] ss:$8 sps:$4 sm:$0xff]   ;;  %v1025_v59 = vcombine.high %v3680_v55, %v3680_v55 }
 0x105   : > { %3672 = vmatmul.mubr.msk.bf16.gmra.mrb[8].mxu1 %vm834_vm2, %v778_v42  ;;  %v750_v3 = vmul.f32 0.01, %v709_v61  ;;  %v712_v4 = vadd.f32 %v4575_v63, %v711_v2  ;;  %v4100_v42 = vld [vmem:[%s5602_s7 + $0x40] ss:$8 sps:$4 sm:$0xff]   ;;  %v4120_v62 = vld [vmem:[%s5602_s7 + $0xa4] ss:$8 sps:$4 sm:$0xff]  }
 0x106   : > { %927 = vmatprep.mubr.bf16.mxu1 %v4336_v39  ;;  %v771_v5 = vmax.f32 %v717_v58, %v752_v0  ;;  %v753_v6 = vmul.f32 0.01, %v720_v1  ;;  %1772 = vmatpush1.bf16.msra.mxu1 %v4094_v37  ;;  %v4117_v58 = vld [vmem:[%s5602_s7 + $0x94] ss:$8 sps:$4 sm:$0xff]  }
 0x107   : > { %v769_v7 = vmax.f32 %v709_v61, %v750_v3  ;;  %v751_v8 = vmul.f32 0.01, %v712_v4  ;;  %v4715_v3 = vsub.s32 0, %v1030_v53 }
 0x108   : > { %v772_v9 = vmax.f32 %v720_v1, %v753_v6  ;;  %v4118_v1 = vld [vmem:[%s5602_s7 + $0xa0] ss:$8 sps:$4 sm:$0xff]  }
 0x109   : > { %v770_v10 = vmax.f32 %v712_v4, %v751_v8  ;;  %v3987_v11 = vpop.f32.mrb[16].mxu0  ;;  %v4123_v4 = vld [vmem:[%s5602_s7 + $0xb4] ss:$8 sps:$4 sm:$0xff]  }
 0x10a   : > { %v783_v12 = vpack.c.bf16 %v772_v9, %v771_v5  ;;  %v733_v13 = vadd.f32 %v3987_v11, %v4575_v63  ;;  %v724_v14 = vpop.f32.mrb[17].mxu0 }
 0x10b   : > { %v782_v15 = vpack.c.bf16 %v770_v10, %v769_v7  ;;  %v725_v16 = vadd.f32 %v4575_v63, %v724_v14  ;;  %v3988_v17 = vpop.f32.mrb[18].mxu0  ;;  %v4121_v7 = vld [vmem:[%s5602_s7 + $0xb0] ss:$8 sps:$4 sm:$0xff]   ;;  %v4126_v10 = vld [vmem:[%s5602_s7 + $0xc4] ss:$8 sps:$4 sm:$0xff]  }
 0x10c   : > { %v727_v18 = vpop.f32.mrb[19].mxu0 }
 0x10d   : > { %3673 = vmatmul.mubr.msk.bf16.gmra.mrb[12].mxu1 %vm834_vm2, %v779_v38  ;;  %v754_v19 = vmul.f32 0.01, %v725_v16  ;;  %v728_v20 = vadd.f32 %v4575_v63, %v727_v18  ;;  %v756_v63 = vmul.f32 0.01, %v733_v13  ;;  %v4099_v38 = vld [vmem:[%s5602_s7 + $0x34] ss:$8 sps:$4 sm:$0xff]  }
 0x10e   : > { %937 = vmatprep.mubr.bf16.mxu1 %v4336_v39  ;;  %1773 = vmatprep.subr.bf16.mxu1 %v4099_v38  ;;  %v4129_v18 = vld [vmem:[%s5602_s7 + $0xd4] ss:$8 sps:$4 sm:$0xff]  }
 0x10f   : > { %v773_v21 = vmax.f32 %v725_v16, %v754_v19  ;;  %v755_v22 = vmul.f32 0.01, %v728_v20  ;;  %v775_v25 = vmax.f32 %v733_v13, %v756_v63  ;;  %1774 = vmatpush1.bf16.msra.mxu1 %v4097_v40  ;;  %v4124_v16 = vld [vmem:[%s5602_s7 + $0xc0] ss:$8 sps:$4 sm:$0xff]  }
 0x110   : > { %1775 = vmatprep.subr.bf16.mxu1 %v4102_v41 }
 0x111   : > { %v774_v23 = vmax.f32 %v728_v20, %v755_v22  ;;  %v785_v26 = vpack.c.bf16 %v775_v25, %v775_v25 }
 0x113   : > { %v784_v24 = vpack.c.bf16 %v774_v23, %v773_v21  ;;  %1776 = vmatpush1.bf16.msra.mxu1 %v4100_v42  ;;  %v4127_v23 = vld [vmem:[%s5602_s7 + $0xd0] ss:$8 sps:$4 sm:$0xff]  }
 0x114   : > { %1777 = vmatprep.subr.bf16.mxu1 %v4105_v43 }
 0x115   : > { %3674 = vmatmul.mubr.msk.bf16.gmra.mrb[16].mxu1 %vm834_vm2, %v780_v60  ;;  %v4115_v60 = vld [vmem:[%s5602_s7 + $0x90] ss:$8 sps:$4 sm:$0xff]  }
 0x116   : > { %947 = vmatprep.mubr.bf16.mxu1 %v4336_v39 }
 0x117   : > { %1778 = vmatpush1.bf16.msra.mxu1 %v4103_v44 }
 0x118   : > { %1779 = vmatprep.subr.bf16.mxu1 %v4108_v45 }
 0x11b   : > { %1780 = vmatpush1.bf16.msra.mxu1 %v4106_v46 }
 0x11c   : > { %1781 = vmatprep.subr.bf16.mxu1 %v4111_v50 }
 0x11d   : > { %3675 = vmatmul.mubr.msk.bf16.gmra.mrb[20].mxu1 %vm834_vm2, %v781_v57  ;;  %v4699_v57 = vsub.s32 %v1028_v52, %v1030_v53 }
 0x11e   : > { %957 = vmatprep.mubr.bf16.mxu1 %v4336_v39 }
 0x11f   : > { %1782 = vmatpush1.bf16.msra.mxu1 %v4109_v51  ;;  %v1032_v61 = vrot.slane %v3680_v55, %v4699_v57  ;;  %v1039_v0 = vrot.slane %v1025_v59, %v4699_v57 }
 0x120   : > { %1783 = vmatprep.subr.bf16.mxu1 %v4114_v54 }
 0x121   : > { %v1041_v2 = vpack.i.b16 %v1032_v61, %v1032_v61  ;;  %v1048_v5 = vpack.i.b16 %v1039_v0, %v1039_v0 }
 0x123   : > { %1784 = vmatpush1.bf16.msra.mxu1 %v4112_v56  ;;  %v4724_v9 = vrot.slane %v1041_v2, %v4715_v3 }
 0x124   : > { %1785 = vmatprep.subr.bf16.mxu1 %v4117_v58 }
 0x125   : > { %3676 = vmatmul.mubr.msk.bf16.gmra.mrb[24].mxu1 %vm834_vm2, %v782_v15 }
 0x126   : > { %967 = vmatprep.mubr.bf16.mxu1 %v4336_v39 }
 0x127   : > { %1786 = vmatpush1.bf16.msra.mxu1 %v4115_v60 }
 0x128   : > { %1787 = vmatprep.subr.bf16.mxu1 %v4120_v62 }
 0x12b   : > { %1788 = vmatpush1.bf16.msra.mxu1 %v4118_v1 }
 0x12c   : > { %1789 = vmatprep.subr.bf16.mxu1 %v4123_v4 }
 0x12d   : > { %3677 = vmatmul.mubr.msk.bf16.gmra.mrb[28].mxu1 %vm834_vm2, %v783_v12  ;;  %v4730_v12 = vrot.slane %v1048_v5, %v4715_v3 }
 0x12e   : > { %977 = vmatprep.mubr.bf16.mxu1 %v4336_v39 }
 0x12f   : > { %1790 = vmatpush1.bf16.msra.mxu1 %v4121_v7 }
 0x130   : > { %1791 = vmatprep.subr.bf16.mxu1 %v4126_v10 }
 0x133   : > { %1792 = vmatpush1.bf16.msra.mxu1 %v4124_v16 }
 0x134   : > { %1793 = vmatprep.subr.bf16.mxu1 %v4129_v18 }
 0x135   : > { %3678 = vmatmul.mubr.msk.bf16.gmra.mrb[32].mxu1 %vm834_vm2, %v784_v24 }
 0x136   : > { %987 = vmatprep.mubr.bf16.mxu1 %v4336_v39  ;;  %v4082_v39 = vld [vmem:[%s5600_s5 + $0xe0] ss:$8 sps:$4 sm:$0xff]  }
 0x137   : > { %1335 = vmatpush1.bf16.msra.mxu0 %v4082_v39  ;;  %1794 = vmatpush1.bf16.msra.mxu1 %v4127_v23 }
 0x138   : > { %1336 = vmatprep.subr.bf16.mxu0 %v4087_v30 }
 0x13b   : > { %1337 = vmatpush1.bf16.msra.mxu0 %v4085_v31 }
 0x13d   : > { %3679 = vmatmul.mubr.msk.bf16.gmra.mrb[36].mxu1 %vm834_vm2, %v785_v26 }
 0x1c8   : > { %v899_v6 = vpop.f32.mrb[0].mxu1 }
 0x1c9   : > { %v901_v8 = vpop.f32.mrb[1].mxu1 }
 0x1ca   : > { %v903_v11 = vpop.f32.mrb[2].mxu1 }
 0x1cb   : > { %v996_v13 = vpack.c.bf16 %v903_v11, %v899_v6  ;;  %v905_v14 = vpop.f32.mrb[3].mxu1 }
 0x1cc   : > { %v997_v15 = vpack.c.bf16 %v905_v14, %v901_v8 }
 0x1cd   : > { %v1054_v17 = vadd.bf16 %v4724_v9, %v996_v13 }
 0x1ce   : > { %v1055_v19 = vadd.bf16 %v4730_v12, %v997_v15 }
 0x1cf   : > { %v1074_v20 = vmul.bf16 1009007652, %v1054_v17 }
 0x1d0   : > { %v1075_v21 = vmul.bf16 1009007652, %v1055_v19  ;;  %v909_v22 = vpop.f32.mrb[4].mxu1 }
 0x1d1   : > { %v911_v24 = vpop.f32.mrb[5].mxu1  ;;  %v4745_v26 = vmax.bf16 %v1074_v20, %v1054_v17 }
 0x1d2   : > { %v913_v63 = vpop.f32.mrb[6].mxu1  ;;  %v4743_v25 = vmax.bf16 %v1075_v21, %v1055_v19 }
 0x1d3   : > { %v998_v27 = vpack.c.bf16 %v913_v63, %v909_v22  ;;  %v915_v28 = vpop.f32.mrb[7].mxu1 }
 0x1d4   : > { %v999_v29 = vpack.c.bf16 %v915_v28, %v911_v24  ;;  %1338 = vmatprep.mubr.bf16.mxu0 %v4743_v25 }
 0x1d5   : > { %v1056_v39 = vadd.bf16 %v4724_v9, %v998_v27  ;;  %1339 = vmatmul.mubr.bf16.vlgmr.msra.gmra.mrb[20].mxu0 %v4745_v26 }
 0x1d6   : > { %v1057_v30 = vadd.bf16 %v4730_v12, %v999_v29 }
 0x1d7   : > { %v1076_v31 = vmul.bf16 1009007652, %v1056_v39 }
 0x1d8   : > { %v1077_v32 = vmul.bf16 1009007652, %v1057_v30  ;;  %v919_v33 = vpop.f32.mrb[8].mxu1 }
 0x1d9   : > { %v921_v34 = vpop.f32.mrb[9].mxu1  ;;  %v4753_v40 = vmax.bf16 %v1076_v31, %v1056_v39 }
 0x1da   : > { %v923_v35 = vpop.f32.mrb[10].mxu1  ;;  %v4751_v36 = vmax.bf16 %v1077_v32, %v1057_v30 }
 0x1db   : > { %v1000_v37 = vpack.c.bf16 %v923_v35, %v919_v33  ;;  %v925_v38 = vpop.f32.mrb[11].mxu1 }
 0x1dc   : > { %v1001_v41 = vpack.c.bf16 %v925_v38, %v921_v34  ;;  %1348 = vmatprep.mubr.bf16.mxu0 %v4751_v36 }
 0x1dd   : > { %v1058_v42 = vadd.bf16 %v4724_v9, %v1000_v37  ;;  %1349 = vmatmul.mubr.bf16.gmra.mrb[24].mxu0 %v4753_v40 }
 0x1de   : > { %v1059_v43 = vadd.bf16 %v4730_v12, %v1001_v41 }
 0x1df   : > { %v1078_v44 = vmul.bf16 1009007652, %v1058_v42 }
 0x1e0   : > { %v1079_v45 = vmul.bf16 1009007652, %v1059_v43  ;;  %v929_v46 = vpop.f32.mrb[12].mxu1 }
 0x1e1   : > { %v931_v47 = vpop.f32.mrb[13].mxu1  ;;  %v4761_v52 = vmax.bf16 %v1078_v44, %v1058_v42 }
 0x1e2   : > { %v933_v48 = vpop.f32.mrb[14].mxu1  ;;  %v4759_v49 = vmax.bf16 %v1079_v45, %v1059_v43 }
 0x1e3   : > { %v1002_v50 = vpack.c.bf16 %v933_v48, %v929_v46  ;;  %v935_v51 = vpop.f32.mrb[15].mxu1 }
 0x1e4   : > { %v1003_v53 = vpack.c.bf16 %v935_v51, %v931_v47  ;;  %1358 = vmatprep.mubr.bf16.mxu0 %v4759_v49 }
 0x1e5   : > { %v1060_v54 = vadd.bf16 %v4724_v9, %v1002_v50  ;;  %1359 = vmatmul.mubr.bf16.gmra.mrb[28].mxu0 %v4761_v52 }
 0x1e6   : > { %v1061_v55 = vadd.bf16 %v4730_v12, %v1003_v53 }
 0x1e7   : > { %v1080_v56 = vmul.bf16 1009007652, %v1060_v54 }
 0x1e8   : > { %v1081_v58 = vmul.bf16 1009007652, %v1061_v55  ;;  %v939_v59 = vpop.f32.mrb[16].mxu1 }
 0x1e9   : > { %v941_v60 = vpop.f32.mrb[17].mxu1  ;;  %v4769_v2 = vmax.bf16 %v1080_v56, %v1060_v54 }
 0x1ea   : > { %v943_v61 = vpop.f32.mrb[18].mxu1  ;;  %v4767_v62 = vmax.bf16 %v1081_v58, %v1061_v55 }
 0x1eb   : > { %v1004_v0 = vpack.c.bf16 %v943_v61, %v939_v59  ;;  %v945_v1 = vpop.f32.mrb[19].mxu1 }
 0x1ec   : > { %v1005_v4 = vpack.c.bf16 %v945_v1, %v941_v60  ;;  %1368 = vmatprep.mubr.bf16.mxu0 %v4767_v62 }
 0x1ed   : > { %v1062_v5 = vadd.bf16 %v4724_v9, %v1004_v0  ;;  %1369 = vmatmul.mubr.bf16.gmra.mrb[32].mxu0 %v4769_v2 }
 0x1ee   : > { %v1063_v6 = vadd.bf16 %v4730_v12, %v1005_v4 }
 0x1ef   : > { %v1082_v7 = vmul.bf16 1009007652, %v1062_v5 }
 0x1f0   : > { %v1083_v8 = vmul.bf16 1009007652, %v1063_v6  ;;  %v949_v10 = vpop.f32.mrb[20].mxu1 }
 0x1f1   : > { %v951_v11 = vpop.f32.mrb[21].mxu1  ;;  %v4777_v17 = vmax.bf16 %v1082_v7, %v1062_v5 }
 0x1f2   : > { %v953_v13 = vpop.f32.mrb[22].mxu1  ;;  %v4775_v14 = vmax.bf16 %v1083_v8, %v1063_v6 }
 0x1f3   : > { %v1006_v15 = vpack.c.bf16 %v953_v13, %v949_v10  ;;  %v955_v16 = vpop.f32.mrb[23].mxu1 }
 0x1f4   : > { %v1007_v18 = vpack.c.bf16 %v955_v16, %v951_v11  ;;  %1378 = vmatprep.mubr.bf16.mxu0 %v4775_v14 }
 0x1f5   : > { %v1064_v19 = vadd.bf16 %v4724_v9, %v1006_v15  ;;  %1379 = vmatmul.mubr.bf16.gmra.mrb[36].mxu0 %v4777_v17 }
 0x1f6   : > { %v1065_v20 = vadd.bf16 %v4730_v12, %v1007_v18 }
 0x1f7   : > { %v1084_v21 = vmul.bf16 1009007652, %v1064_v19 }
 0x1f8   : > { %v1085_v22 = vmul.bf16 1009007652, %v1065_v20  ;;  %v959_v23 = vpop.f32.mrb[24].mxu1 }
 0x1f9   : > { %v961_v24 = vpop.f32.mrb[25].mxu1  ;;  %v4785_v39 = vmax.bf16 %v1084_v21, %v1064_v19 }
 0x1fa   : > { %v963_v63 = vpop.f32.mrb[26].mxu1  ;;  %v4783_v27 = vmax.bf16 %v1085_v22, %v1065_v20 }
 0x1fb   : > { %v1008_v28 = vpack.c.bf16 %v963_v63, %v959_v23  ;;  %v965_v29 = vpop.f32.mrb[27].mxu1  ;;  %v4135_v23 = vld [vmem:[%s5602_s7 + $0xf4] ss:$8 sps:$4 sm:$0xff]   ;;  %v4136_v63 = vld [vmem:[%s5604_s9] ss:$8 sps:$4 sm:$0xff]  }
 0x1fc   : > { %v1009_v30 = vpack.c.bf16 %v965_v29, %v961_v24  ;;  %1388 = vmatprep.mubr.bf16.mxu0 %v4783_v27  ;;  %v4133_v24 = vld [vmem:[%s5602_s7 + $0xf0] ss:$8 sps:$4 sm:$0xff]   ;;  %v4141_v29 = vld [vmem:[%s5604_s9 + $0x14] ss:$8 sps:$4 sm:$0xff]  }
 0x1fd   : > { %v1066_v31 = vadd.bf16 %v4724_v9, %v1008_v28  ;;  %1389 = vmatmul.mubr.bf16.gmra.mrb[40].mxu0 %v4785_v39  ;;  %v4138_v28 = vld [vmem:[%s5604_s9 + $0x4] ss:$8 sps:$4 sm:$0xff]  }
 0x1fe   : > { %v1067_v32 = vadd.bf16 %v4730_v12, %v1009_v30  ;;  %2228 = vmatprep.subr.bf16.mxu0 %v4138_v28  ;;  %v4139_v30 = vld [vmem:[%s5604_s9 + $0x10] ss:$8 sps:$4 sm:$0xff]   ;;  %v4177_v28 = vld [vmem:[%s5604_s9 + $0xd4] ss:$8 sps:$4 sm:$0xff]  }
 0x1ff   : > { %v1086_v33 = vmul.bf16 1009007652, %v1066_v31  ;;  %2229 = vmatpush1.bf16.msra.mxu0 %v4136_v63 }
 0x200   : > { %v1087_v34 = vmul.bf16 1009007652, %v1067_v32  ;;  %v969_v35 = vpop.f32.mrb[28].mxu1  ;;  %2230 = vmatprep.subr.bf16.mxu0 %v4141_v29 }
 0x201   : > { %v971_v37 = vpop.f32.mrb[29].mxu1  ;;  %v4793_v44 = vmax.bf16 %v1086_v33, %v1066_v31  ;;  %v4144_v31 = vld [vmem:[%s5604_s9 + $0x24] ss:$8 sps:$4 sm:$0xff]   ;;  %v4147_v33 = vld [vmem:[%s5604_s9 + $0x34] ss:$8 sps:$4 sm:$0xff]  }
 0x202   : > { %v973_v38 = vpop.f32.mrb[30].mxu1  ;;  %v4791_v41 = vmax.bf16 %v1087_v34, %v1067_v32  ;;  %v4142_v32 = vld [vmem:[%s5604_s9 + $0x20] ss:$8 sps:$4 sm:$0xff]   ;;  %v4145_v34 = vld [vmem:[%s5604_s9 + $0x30] ss:$8 sps:$4 sm:$0xff]  }
 0x203   : > { %v1010_v42 = vpack.c.bf16 %v973_v38, %v969_v35  ;;  %v975_v43 = vpop.f32.mrb[31].mxu1  ;;  %2231 = vmatpush1.bf16.msra.mxu0 %v4139_v30  ;;  %v4150_v35 = vld [vmem:[%s5604_s9 + $0x44] ss:$8 sps:$4 sm:$0xff]   ;;  %v4153_v38 = vld [vmem:[%s5604_s9 + $0x54] ss:$8 sps:$4 sm:$0xff]  }
 0x204   : > { %v1011_v45 = vpack.c.bf16 %v975_v43, %v971_v37  ;;  %1398 = vmatprep.mubr.bf16.mxu0 %v4791_v41  ;;  %2232 = vmatprep.subr.bf16.mxu0 %v4144_v31  ;;  %v4148_v37 = vld [vmem:[%s5604_s9 + $0x40] ss:$8 sps:$4 sm:$0xff]   ;;  %v4156_v43 = vld [vmem:[%s5604_s9 + $0x64] ss:$8 sps:$4 sm:$0xff]  }
 0x205   : > { %v1068_v46 = vadd.bf16 %v4724_v9, %v1010_v42  ;;  %1399 = vmatmul.mubr.bf16.gmra.mrb[44].mxu0 %v4793_v44  ;;  %v4151_v42 = vld [vmem:[%s5604_s9 + $0x50] ss:$8 sps:$4 sm:$0xff]  }
 0x206   : > { %v1069_v47 = vadd.bf16 %v4730_v12, %v1011_v45  ;;  %v4154_v45 = vld [vmem:[%s5604_s9 + $0x60] ss:$8 sps:$4 sm:$0xff]  }
 0x207   : > { %v1088_v48 = vmul.bf16 1009007652, %v1068_v46  ;;  %2233 = vmatpush1.bf16.msra.mxu0 %v4142_v32 }
 0x208   : > { %v1089_v50 = vmul.bf16 1009007652, %v1069_v47  ;;  %v979_v51 = vpop.f32.mrb[32].mxu1  ;;  %2234 = vmatprep.subr.bf16.mxu0 %v4147_v33 }
 0x209   : > { %v981_v53 = vpop.f32.mrb[33].mxu1  ;;  %v4801_v59 = vmax.bf16 %v1088_v48, %v1068_v46  ;;  %v4159_v46 = vld [vmem:[%s5604_s9 + $0x74] ss:$8 sps:$4 sm:$0xff]  }
 0x20a   : > { %v983_v54 = vpop.f32.mrb[34].mxu1  ;;  %v4799_v55 = vmax.bf16 %v1089_v50, %v1069_v47  ;;  %v4157_v47 = vld [vmem:[%s5604_s9 + $0x70] ss:$8 sps:$4 sm:$0xff]   ;;  %v4162_v50 = vld [vmem:[%s5604_s9 + $0x84] ss:$8 sps:$4 sm:$0xff]  }
 0x20b   : > { %v1012_v56 = vpack.c.bf16 %v983_v54, %v979_v51  ;;  %v985_v58 = vpop.f32.mrb[35].mxu1  ;;  %2235 = vmatpush1.bf16.msra.mxu0 %v4145_v34  ;;  %v3713_v48 = vld.sshfl [vmem:[%s5601_s6] sm:$0x11 pattern:$0x75316420] }
 0x20c   : > { %v1013_v60 = vpack.c.bf16 %v985_v58, %v981_v53  ;;  %1408 = vmatprep.mubr.bf16.mxu0 %v4799_v55  ;;  %2236 = vmatprep.subr.bf16.mxu0 %v4150_v35  ;;  %v1466_v51 = vcombine.high %v3713_v48, %v3713_v48  ;;  %v4160_v53 = vld [vmem:[%s5604_s9 + $0x80] ss:$8 sps:$4 sm:$0xff]   ;;  %v4165_v54 = vld [vmem:[%s5604_s9 + $0x94] ss:$8 sps:$4 sm:$0xff]   ;;  %v4175_v35 = vld [vmem:[%s5604_s9 + $0xd0] ss:$8 sps:$4 sm:$0xff]  }
 0x20d   : > { %v1070_v61 = vadd.bf16 %v4724_v9, %v1012_v56  ;;  %1409 = vmatmul.mubr.bf16.gmra.mrb[48].mxu0 %v4801_v59  ;;  %v1473_v56 = vrot.slane %v3713_v48, %v4699_v57 }
 0x20e   : > { %v1071_v0 = vadd.bf16 %v4730_v12, %v1013_v60  ;;  %v1480_v58 = vrot.slane %v1466_v51, %v4699_v57  ;;  %v4163_v60 = vld [vmem:[%s5604_s9 + $0x90] ss:$8 sps:$4 sm:$0xff]  }
 0x20f   : > { %v1090_v1 = vmul.bf16 1009007652, %v1070_v61  ;;  %2237 = vmatpush1.bf16.msra.mxu0 %v4148_v37 }
 0x210   : > { %v1091_v4 = vmul.bf16 1009007652, %v1071_v0  ;;  %v989_v5 = vpop.f32.mrb[36].mxu1  ;;  %2238 = vmatprep.subr.bf16.mxu0 %v4153_v38 }
 0x211   : > { %v1014_v6 = vpack.c.bf16 %v989_v5, %v989_v5  ;;  %v991_v7 = vpop.f32.mrb[37].mxu1  ;;  %v4810_v16 = vmax.bf16 %v1090_v1, %v1070_v61  ;;  %v4168_v61 = vld [vmem:[%s5604_s9 + $0xa4] ss:$8 sps:$4 sm:$0xff]   ;;  %v1489_v1 = vpack.i.b16 %v1480_v58, %v1480_v58  ;;  %v4171_v5 = vld [vmem:[%s5604_s9 + $0xb4] ss:$8 sps:$4 sm:$0xff]  }
 0x212   : > { %v1015_v8 = vpack.c.bf16 %v991_v7, %v991_v7  ;;  %v993_v10 = vpop.f32.mrb[38].mxu1  ;;  %v4807_v11 = vmax.bf16 %v1091_v4, %v1071_v0  ;;  %v1482_v0 = vpack.i.b16 %v1473_v56, %v1473_v56  ;;  %v4166_v4 = vld [vmem:[%s5604_s9 + $0xa0] ss:$8 sps:$4 sm:$0xff]  }
 0x213   : > { %v1072_v13 = vadd.bf16 %v4724_v9, %v1014_v6  ;;  %v994_v15 = vpop.f32.mrb[39].mxu1  ;;  %v4132_v9 = vld [vmem:[%s5602_s7 + $0xe4] ss:$8 sps:$4 sm:$0xff]   ;;  %2239 = vmatpush1.bf16.msra.mxu0 %v4151_v42 }
 0x214   : > { %v1073_v18 = vadd.bf16 %v4730_v12, %v1015_v8  ;;  %1418 = vmatprep.mubr.bf16.mxu0 %v4807_v11  ;;  %v4130_v12 = vld [vmem:[%s5602_s7 + $0xe0] ss:$8 sps:$4 sm:$0xff]   ;;  %1795 = vmatprep.subr.bf16.mxu1 %v4132_v9  ;;  %v4908_v8 = vrot.slane %v1482_v0, %v4715_v3  ;;  %v4169_v15 = vld [vmem:[%s5604_s9 + $0xb0] ss:$8 sps:$4 sm:$0xff]  }
 0x215   : > { %1419 = vmatmul.mubr.bf16.gmra.mrb[52].mxu0 %v4810_v16  ;;  %v1092_v20 = vmul.bf16 1009007652, %v1072_v13  ;;  %1796 = vmatpush1.bf16.msra.mxu1 %v4130_v12 }
 0x216   : > { %v1093_v19 = vmul.bf16 1009007652, %v1073_v18  ;;  %1797 = vmatprep.subr.bf16.mxu1 %v4135_v23  ;;  %2240 = vmatprep.subr.bf16.mxu0 %v4156_v43 }
 0x217   : > { %v4818_v22 = vmax.bf16 %v1092_v20, %v1072_v13  ;;  %2241 = vmatpush1.bf16.msra.mxu0 %v4154_v45  ;;  %v4911_v13 = vrot.slane %v1489_v1, %v4715_v3  ;;  %v4174_v20 = vld [vmem:[%s5604_s9 + $0xc4] ss:$8 sps:$4 sm:$0xff]  }
 0x218   : > { %v4815_v21 = vmax.bf16 %v1093_v19, %v1073_v18  ;;  %2242 = vmatprep.subr.bf16.mxu0 %v4159_v46 }
 0x219   : > { %1798 = vmatpush1.bf16.msra.mxu1 %v4133_v24  ;;  %v4172_v24 = vld [vmem:[%s5604_s9 + $0xc0] ss:$8 sps:$4 sm:$0xff]  }
 0x21a   : > { %1428 = vmatprep.mubr.bf16.mxu0 %v4815_v21 }
 0x21b   : > { %2243 = vmatpush1.bf16.msra.mxu0 %v4157_v47 }
 0x21c   : > { %2244 = vmatprep.subr.bf16.mxu0 %v4162_v50 }
 0x21d   : > { %1429 = vmatmul.mubr.bf16.gmra.mrb[56].mxu0 %v4818_v22 }
 0x21f   : > { %2245 = vmatpush1.bf16.msra.mxu0 %v4160_v53 }
 0x220   : > { %2246 = vmatprep.subr.bf16.mxu0 %v4165_v54 }
 0x223   : > { %2247 = vmatpush1.bf16.msra.mxu0 %v4163_v60 }
 0x224   : > { %2248 = vmatprep.subr.bf16.mxu0 %v4168_v61 }
 0x227   : > { %2249 = vmatpush1.bf16.msra.mxu0 %v4166_v4 }
 0x228   : > { %2250 = vmatprep.subr.bf16.mxu0 %v4171_v5 }
 0x22b   : > { %2251 = vmatpush1.bf16.msra.mxu0 %v4169_v15 }
 0x22c   : > { %2252 = vmatprep.subr.bf16.mxu0 %v4174_v20 }
 0x22f   : > { %2253 = vmatpush1.bf16.msra.mxu0 %v4172_v24 }
 0x230   : > { %2254 = vmatprep.subr.bf16.mxu0 %v4177_v28 }
 0x233   : > { %2255 = vmatpush1.bf16.msra.mxu0 %v4175_v35 }
 0x2a8   : > { %v1340_v6 = vpop.f32.mrb[20].mxu0 }
 0x2a9   : > { %v1342_v7 = vpop.f32.mrb[21].mxu0 }
 0x2aa   : > { %v1344_v10 = vpop.f32.mrb[22].mxu0 }
 0x2ab   : > { %v1437_v18 = vpack.c.bf16 %v1344_v10, %v1340_v6  ;;  %v1346_v19 = vpop.f32.mrb[23].mxu0 }
 0x2ac   : > { %v1438_v9 = vpack.c.bf16 %v1346_v19, %v1342_v7 }
 0x2ad   : > { %v1495_v12 = vadd.bf16 %v4908_v8, %v1437_v18 }
 0x2ae   : > { %v1496_v23 = vadd.bf16 %v4911_v13, %v1438_v9 }
 0x2af   : > { %v1515_v63 = vadd.bf16 %v1495_v12, %v4745_v26 }
 0x2b0   : > { %v1516_v29 = vadd.bf16 %v1496_v23, %v4743_v25  ;;  %v1350_v30 = vpop.f32.mrb[24].mxu0 }
 0x2b1   : > { %v1535_v31 = vmul.bf16 1009007652, %v1515_v63  ;;  %v1352_v32 = vpop.f32.mrb[25].mxu0 }
 0x2b2   : > { %v1354_v33 = vpop.f32.mrb[26].mxu0  ;;  %v1536_v34 = vmul.bf16 1009007652, %v1516_v29 }
 0x2b3   : > { %v1439_v37 = vpack.c.bf16 %v1354_v33, %v1350_v30  ;;  %v1356_v38 = vpop.f32.mrb[27].mxu0  ;;  %v4934_v45 = vmax.bf16 %v1535_v31, %v1515_v63 }
 0x2b4   : > { %v1440_v42 = vpack.c.bf16 %v1356_v38, %v1352_v32  ;;  %v4932_v43 = vmax.bf16 %v1536_v34, %v1516_v29 }
 0x2b5   : > { %v1497_v46 = vadd.bf16 %v4908_v8, %v1439_v37 }
 0x2b6   : > { %v1498_v47 = vadd.bf16 %v4911_v13, %v1440_v42  ;;  %1799 = vmatprep.mubr.bf16.mxu1 %v4932_v43 }
 0x2b7   : > { %v1517_v48 = vadd.bf16 %v1497_v46, %v4753_v40  ;;  %1800 = vmatmul.mubr.bf16.vlgmr.msra.gmra.mrb[40].mxu1 %v4934_v45 }
 0x2b8   : > { %v1518_v50 = vadd.bf16 %v1498_v47, %v4751_v36  ;;  %v1360_v51 = vpop.f32.mrb[28].mxu0 }
 0x2b9   : > { %v1362_v53 = vpop.f32.mrb[29].mxu0  ;;  %v1537_v54 = vmul.bf16 1009007652, %v1517_v48 }
 0x2ba   : > { %v1364_v56 = vpop.f32.mrb[30].mxu0  ;;  %v1538_v58 = vmul.bf16 1009007652, %v1518_v50 }
 0x2bb   : > { %v1441_v60 = vpack.c.bf16 %v1364_v56, %v1360_v51  ;;  %v1366_v61 = vpop.f32.mrb[31].mxu0  ;;  %v4945_v5 = vmax.bf16 %v1537_v54, %v1517_v48 }
 0x2bc   : > { %v1442_v0 = vpack.c.bf16 %v1366_v61, %v1362_v53  ;;  %v4942_v1 = vmax.bf16 %v1538_v58, %v1518_v50 }
 0x2bd   : > { %v1499_v4 = vadd.bf16 %v4908_v8, %v1441_v60 }
 0x2be   : > { %v1500_v6 = vadd.bf16 %v4911_v13, %v1442_v0  ;;  %1809 = vmatprep.mubr.bf16.mxu1 %v4942_v1 }
 0x2bf   : > { %v1519_v7 = vadd.bf16 %v1499_v4, %v4761_v52  ;;  %1810 = vmatmul.mubr.bf16.gmra.mrb[44].mxu1 %v4945_v5 }
 0x2c0   : > { %v1520_v10 = vadd.bf16 %v1500_v6, %v4759_v49  ;;  %v1370_v15 = vpop.f32.mrb[32].mxu0 }
 0x2c1   : > { %v1372_v18 = vpop.f32.mrb[33].mxu0  ;;  %v1539_v19 = vmul.bf16 1009007652, %v1519_v7 }
 0x2c2   : > { %v1374_v20 = vpop.f32.mrb[34].mxu0  ;;  %v1540_v9 = vmul.bf16 1009007652, %v1520_v10 }
 0x2c3   : > { %v1443_v12 = vpack.c.bf16 %v1374_v20, %v1370_v15  ;;  %v1376_v23 = vpop.f32.mrb[35].mxu0  ;;  %v4955_v29 = vmax.bf16 %v1539_v19, %v1519_v7 }
 0x2c4   : > { %v1444_v24 = vpack.c.bf16 %v1376_v23, %v1372_v18  ;;  %v4952_v63 = vmax.bf16 %v1540_v9, %v1520_v10 }
 0x2c5   : > { %v1501_v28 = vadd.bf16 %v4908_v8, %v1443_v12 }
 0x2c6   : > { %v1502_v30 = vadd.bf16 %v4911_v13, %v1444_v24  ;;  %1819 = vmatprep.mubr.bf16.mxu1 %v4952_v63 }
 0x2c7   : > { %v1521_v31 = vadd.bf16 %v1501_v28, %v4769_v2  ;;  %1820 = vmatmul.mubr.bf16.gmra.mrb[48].mxu1 %v4955_v29 }
 0x2c8   : > { %v1522_v32 = vadd.bf16 %v1502_v30, %v4767_v62  ;;  %v1380_v33 = vpop.f32.mrb[36].mxu0 }
 0x2c9   : > { %v1382_v34 = vpop.f32.mrb[37].mxu0  ;;  %v1541_v35 = vmul.bf16 1009007652, %v1521_v31 }
 0x2ca   : > { %v1384_v37 = vpop.f32.mrb[38].mxu0  ;;  %v1542_v38 = vmul.bf16 1009007652, %v1522_v32 }
 0x2cb   : > { %v1445_v42 = vpack.c.bf16 %v1384_v37, %v1380_v33  ;;  %v1386_v46 = vpop.f32.mrb[39].mxu0  ;;  %v4965_v51 = vmax.bf16 %v1541_v35, %v1521_v31 }
 0x2cc   : > { %v1446_v47 = vpack.c.bf16 %v1386_v46, %v1382_v34  ;;  %v4962_v48 = vmax.bf16 %v1542_v38, %v1522_v32 }
 0x2cd   : > { %v1503_v50 = vadd.bf16 %v4908_v8, %v1445_v42 }
 0x2ce   : > { %v1504_v53 = vadd.bf16 %v4911_v13, %v1446_v47  ;;  %1829 = vmatprep.mubr.bf16.mxu1 %v4962_v48 }
 0x2cf   : > { %v1523_v54 = vadd.bf16 %v1503_v50, %v4777_v17  ;;  %1830 = vmatmul.mubr.bf16.gmra.mrb[52].mxu1 %v4965_v51 }
 0x2d0   : > { %v1524_v56 = vadd.bf16 %v1504_v53, %v4775_v14  ;;  %v1390_v58 = vpop.f32.mrb[40].mxu0 }
 0x2d1   : > { %v1392_v60 = vpop.f32.mrb[41].mxu0  ;;  %v1543_v61 = vmul.bf16 1009007652, %v1523_v54 }
 0x2d2   : > { %v1394_v0 = vpop.f32.mrb[42].mxu0  ;;  %v1544_v4 = vmul.bf16 1009007652, %v1524_v56 }
 0x2d3   : > { %v1447_v6 = vpack.c.bf16 %v1394_v0, %v1390_v58  ;;  %v1396_v7 = vpop.f32.mrb[43].mxu0  ;;  %v4975_v19 = vmax.bf16 %v1543_v61, %v1523_v54 }
 0x2d4   : > { %v1448_v10 = vpack.c.bf16 %v1396_v7, %v1392_v60  ;;  %v4972_v15 = vmax.bf16 %v1544_v4, %v1524_v56 }
 0x2d5   : > { %v1505_v18 = vadd.bf16 %v4908_v8, %v1447_v6 }
 0x2d6   : > { %v1506_v20 = vadd.bf16 %v4911_v13, %v1448_v10  ;;  %1839 = vmatprep.mubr.bf16.mxu1 %v4972_v15 }
 0x2d7   : > { %v1525_v9 = vadd.bf16 %v1505_v18, %v4785_v39  ;;  %1840 = vmatmul.mubr.bf16.gmra.mrb[56].mxu1 %v4975_v19 }
 0x2d8   : > { %v1526_v12 = vadd.bf16 %v1506_v20, %v4783_v27  ;;  %v1400_v23 = vpop.f32.mrb[44].mxu0 }
 0x2d9   : > { %v1402_v24 = vpop.f32.mrb[45].mxu0  ;;  %v1545_v28 = vmul.bf16 1009007652, %v1525_v9 }
 0x2da   : > { %v1404_v30 = vpop.f32.mrb[46].mxu0  ;;  %v1546_v31 = vmul.bf16 1009007652, %v1526_v12 }
 0x2db   : > { %v1449_v32 = vpack.c.bf16 %v1404_v30, %v1400_v23  ;;  %v1406_v33 = vpop.f32.mrb[47].mxu0  ;;  %v4985_v38 = vmax.bf16 %v1545_v28, %v1525_v9 }
 0x2dc   : > { %v1450_v34 = vpack.c.bf16 %v1406_v33, %v1402_v24  ;;  %v4982_v35 = vmax.bf16 %v1546_v31, %v1526_v12 }
 0x2dd   : > { %v1507_v37 = vadd.bf16 %v4908_v8, %v1449_v32 }
 0x2de   : > { %v1508_v42 = vadd.bf16 %v4911_v13, %v1450_v34  ;;  %1849 = vmatprep.mubr.bf16.mxu1 %v4982_v35 }
 0x2df   : > { %v1527_v46 = vadd.bf16 %v1507_v37, %v4793_v44  ;;  %1850 = vmatmul.mubr.bf16.gmra.mrb[60].mxu1 %v4985_v38 }
 0x2e0   : > { %v1528_v47 = vadd.bf16 %v1508_v42, %v4791_v41  ;;  %v1410_v50 = vpop.f32.mrb[48].mxu0 }
 0x2e1   : > { %v1412_v53 = vpop.f32.mrb[49].mxu0  ;;  %v1547_v54 = vmul.bf16 1009007652, %v1527_v46 }
 0x2e2   : > { %v1414_v56 = vpop.f32.mrb[50].mxu0  ;;  %v1548_v58 = vmul.bf16 1009007652, %v1528_v47 }
 0x2e3   : > { %v1451_v60 = vpack.c.bf16 %v1414_v56, %v1410_v50  ;;  %v1416_v61 = vpop.f32.mrb[51].mxu0  ;;  %v4995_v7 = vmax.bf16 %v1547_v54, %v1527_v46 }
 0x2e4   : > { %v1452_v0 = vpack.c.bf16 %v1416_v61, %v1412_v53  ;;  %v4992_v4 = vmax.bf16 %v1548_v58, %v1528_v47 }
 0x2e5   : > { %v1509_v6 = vadd.bf16 %v4908_v8, %v1451_v60 }
 0x2e6   : > { %v1510_v10 = vadd.bf16 %v4911_v13, %v1452_v0  ;;  %1859 = vmatprep.mubr.bf16.mxu1 %v4992_v4 }
 0x2e7   : > { %v1529_v18 = vadd.bf16 %v1509_v6, %v4801_v59  ;;  %1860 = vmatmul.mubr.bf16.gmra.mrb[64].mxu1 %v4995_v7 }
 0x2e8   : > { %v1530_v20 = vadd.bf16 %v1510_v10, %v4799_v55  ;;  %v1420_v9 = vpop.f32.mrb[52].mxu0 }
 0x2e9   : > { %v1422_v12 = vpop.f32.mrb[53].mxu0  ;;  %v1549_v23 = vmul.bf16 1009007652, %v1529_v18 }
 0x2ea   : > { %v1424_v24 = vpop.f32.mrb[54].mxu0  ;;  %v1550_v28 = vmul.bf16 1009007652, %v1530_v20 }
 0x2eb   : > { %v1453_v30 = vpack.c.bf16 %v1424_v24, %v1420_v9  ;;  %v1426_v31 = vpop.f32.mrb[55].mxu0  ;;  %v5005_v37 = vmax.bf16 %v1549_v23, %v1529_v18 }
 0x2ec   : > { %v1454_v32 = vpack.c.bf16 %v1426_v31, %v1422_v12  ;;  %v5002_v33 = vmax.bf16 %v1550_v28, %v1530_v20  ;;  %v4183_v31 = vld [vmem:[%s5604_s9 + $0xf4] ss:$8 sps:$4 sm:$0xff]  }
 0x2ed   : > { %v1511_v34 = vadd.bf16 %v4908_v8, %v1453_v30  ;;  %v4178_v30 = vld [vmem:[%s5604_s9 + $0xe0] ss:$8 sps:$4 sm:$0xff]  }
 0x2ee   : > { %v1512_v42 = vadd.bf16 %v4911_v13, %v1454_v32  ;;  %1869 = vmatprep.mubr.bf16.mxu1 %v5002_v33  ;;  %v4181_v32 = vld [vmem:[%s5604_s9 + $0xf0] ss:$8 sps:$4 sm:$0xff]  }
 0x2ef   : > { %v1531_v46 = vadd.bf16 %v1511_v34, %v4810_v16  ;;  %1870 = vmatmul.mubr.bf16.gmra.mrb[68].mxu1 %v5005_v37  ;;  %v4184_v34 = vld [vmem:[%s5606_s11] ss:$8 sps:$4 sm:$0xff]  }
 0x2f0   : > { %v1532_v47 = vadd.bf16 %v1512_v42, %v4807_v11  ;;  %v1430_v50 = vpop.f32.mrb[56].mxu0  ;;  %v4186_v42 = vld [vmem:[%s5606_s11 + $0x4] ss:$8 sps:$4 sm:$0xff]  }
 0x2f1   : > { %v1455_v53 = vpack.c.bf16 %v1430_v50, %v1430_v50  ;;  %v1432_v54 = vpop.f32.mrb[57].mxu0  ;;  %v1551_v56 = vmul.bf16 1009007652, %v1531_v46  ;;  %2689 = vmatprep.subr.bf16.mxu1 %v4186_v42  ;;  %v4192_v50 = vld [vmem:[%s5606_s11 + $0x24] ss:$8 sps:$4 sm:$0xff]  }
 0x2f2   : > { %v1456_v58 = vpack.c.bf16 %v1432_v54, %v1432_v54  ;;  %v1434_v60 = vpop.f32.mrb[58].mxu0  ;;  %v1552_v61 = vmul.bf16 1009007652, %v1532_v47  ;;  %2690 = vmatpush1.bf16.msra.mxu1 %v4184_v34  ;;  %v4195_v54 = vld [vmem:[%s5606_s11 + $0x34] ss:$8 sps:$4 sm:$0xff]  }
 0x2f3   : > { %v1513_v0 = vadd.bf16 %v4908_v8, %v1455_v53  ;;  %v1435_v6 = vpop.f32.mrb[59].mxu0  ;;  %v5017_v9 = vmax.bf16 %v1551_v56, %v1531_v46  ;;  %v4189_v46 = vld [vmem:[%s5606_s11 + $0x14] ss:$8 sps:$4 sm:$0xff]   ;;  %v4190_v53 = vld [vmem:[%s5606_s11 + $0x20] ss:$8 sps:$4 sm:$0xff]  }
 0x2f4   : > { %v1514_v10 = vadd.bf16 %v4911_v13, %v1456_v58  ;;  %v5014_v18 = vmax.bf16 %v1552_v61, %v1532_v47  ;;  %v4180_v13 = vld [vmem:[%s5604_s9 + $0xe4] ss:$8 sps:$4 sm:$0xff]   ;;  %v4187_v47 = vld [vmem:[%s5606_s11 + $0x10] ss:$8 sps:$4 sm:$0xff]   ;;  %2691 = vmatprep.subr.bf16.mxu1 %v4189_v46  ;;  %v4196_v60 = vld [vmem:[%s5606_s11 + $0x40] ss:$8 sps:$4 sm:$0xff]  }
 0x2f5   : > { %v1533_v20 = vadd.bf16 %v1513_v0, %v4818_v22  ;;  %2256 = vmatprep.subr.bf16.mxu0 %v4180_v13  ;;  %v4193_v56 = vld [vmem:[%s5606_s11 + $0x30] ss:$8 sps:$4 sm:$0xff]   ;;  %v4198_v58 = vld [vmem:[%s5606_s11 + $0x44] ss:$8 sps:$4 sm:$0xff]   ;;  %v4201_v61 = vld [vmem:[%s5606_s11 + $0x54] ss:$8 sps:$4 sm:$0xff]  }
 0x2f6   : > { %v1534_v12 = vadd.bf16 %v1514_v10, %v4815_v21  ;;  %1879 = vmatprep.mubr.bf16.mxu1 %v5014_v18  ;;  %2257 = vmatpush1.bf16.msra.mxu0 %v4178_v30  ;;  %v4199_v0 = vld [vmem:[%s5606_s11 + $0x50] ss:$8 sps:$4 sm:$0xff]   ;;  %v4204_v6 = vld [vmem:[%s5606_s11 + $0x64] ss:$8 sps:$4 sm:$0xff]   ;;  %v4202_v10 = vld [vmem:[%s5606_s11 + $0x60] ss:$8 sps:$4 sm:$0xff]  }
 0x2f7   : > { %1880 = vmatmul.mubr.bf16.gmra.mrb[72].mxu1 %v5017_v9  ;;  %v1553_v24 = vmul.bf16 1009007652, %v1533_v20  ;;  %2258 = vmatprep.subr.bf16.mxu0 %v4183_v31  ;;  %v4208_v30 = vld [vmem:[%s5606_s11 + $0x80] ss:$8 sps:$4 sm:$0xff]   ;;  %v4213_v31 = vld [vmem:[%s5606_s11 + $0x94] ss:$8 sps:$4 sm:$0xff]  }
 0x2f8   : > { %v1554_v23 = vmul.bf16 1009007652, %v1534_v12  ;;  %2692 = vmatpush1.bf16.msra.mxu1 %v4187_v47  ;;  %v4211_v42 = vld [vmem:[%s5606_s11 + $0x90] ss:$8 sps:$4 sm:$0xff]   ;;  %v4216_v46 = vld [vmem:[%s5606_s11 + $0xa4] ss:$8 sps:$4 sm:$0xff]  }
 0x2f9   : > { %v5025_v8 = vmax.bf16 %v1553_v24, %v1533_v20  ;;  %2693 = vmatprep.subr.bf16.mxu1 %v4192_v50  ;;  %v4207_v20 = vld [vmem:[%s5606_s11 + $0x74] ss:$8 sps:$4 sm:$0xff]   ;;  %v4210_v24 = vld [vmem:[%s5606_s11 + $0x84] ss:$8 sps:$4 sm:$0xff]  }
 0x2fa   : > { %v5022_v28 = vmax.bf16 %v1554_v23, %v1534_v12  ;;  %2259 = vmatpush1.bf16.msra.mxu0 %v4181_v32  ;;  %v4205_v12 = vld [vmem:[%s5606_s11 + $0x70] ss:$8 sps:$4 sm:$0xff]   ;;  %v3746_v23 = vld.sshfl [vmem:[%s5603_s8] sm:$0x11 pattern:$0x75316420] }
 0x2fb   : > { %v1927_v13 = vcombine.high %v3746_v23, %v3746_v23  ;;  %v1934_v32 = vrot.slane %v3746_v23, %v4699_v57 }
 0x2fc   : > { %1889 = vmatprep.mubr.bf16.mxu1 %v5022_v28  ;;  %2694 = vmatpush1.bf16.msra.mxu1 %v4190_v53  ;;  %v4214_v53 = vld [vmem:[%s5606_s11 + $0xa0] ss:$8 sps:$4 sm:$0xff]  }
 0x2fd   : > { %2695 = vmatprep.subr.bf16.mxu1 %v4195_v54  ;;  %v1941_v34 = vrot.slane %v1927_v13, %v4699_v57  ;;  %v1943_v47 = vpack.i.b16 %v1934_v32, %v1934_v32  ;;  %v4219_v54 = vld [vmem:[%s5606_s11 + $0xb4] ss:$8 sps:$4 sm:$0xff]  }
 0x2fe   : > { %v4225_v32 = vld [vmem:[%s5606_s11 + $0xd4] ss:$8 sps:$4 sm:$0xff]  }
 0x2ff   : > { %1890 = vmatmul.mubr.bf16.gmra.mrb[76].mxu1 %v5025_v8  ;;  %v1950_v50 = vpack.i.b16 %v1941_v34, %v1941_v34 }
 0x300   : > { %2696 = vmatpush1.bf16.msra.mxu1 %v4193_v56 }
 0x301   : > { %2697 = vmatprep.subr.bf16.mxu1 %v4198_v58 }
 0x304   : > { %2698 = vmatpush1.bf16.msra.mxu1 %v4196_v60  ;;  %v5115_v60 = vrot.slane %v1943_v47, %v4715_v3 }
 0x305   : > { %2699 = vmatprep.subr.bf16.mxu1 %v4201_v61 }
 0x308   : > { %2700 = vmatpush1.bf16.msra.mxu1 %v4199_v0  ;;  %v5118_v0 = vrot.slane %v1950_v50, %v4715_v3 }
 0x309   : > { %2701 = vmatprep.subr.bf16.mxu1 %v4204_v6  ;;  %v4217_v6 = vld [vmem:[%s5606_s11 + $0xb0] ss:$8 sps:$4 sm:$0xff]  }
 0x30c   : > { %2702 = vmatpush1.bf16.msra.mxu1 %v4202_v10 }
 0x30d   : > { %2703 = vmatprep.subr.bf16.mxu1 %v4207_v20 }
 0x310   : > { %2704 = vmatpush1.bf16.msra.mxu1 %v4205_v12  ;;  %v4222_v12 = vld [vmem:[%s5606_s11 + $0xc4] ss:$8 sps:$4 sm:$0xff]  }
 0x311   : > { %2705 = vmatprep.subr.bf16.mxu1 %v4210_v24 }
 0x314   : > { %2706 = vmatpush1.bf16.msra.mxu1 %v4208_v30  ;;  %v4220_v30 = vld [vmem:[%s5606_s11 + $0xc0] ss:$8 sps:$4 sm:$0xff]  }
 0x315   : > { %2707 = vmatprep.subr.bf16.mxu1 %v4213_v31 }
 0x318   : > { %2708 = vmatpush1.bf16.msra.mxu1 %v4211_v42 }
 0x319   : > { %2709 = vmatprep.subr.bf16.mxu1 %v4216_v46 }
 0x31c   : > { %2710 = vmatpush1.bf16.msra.mxu1 %v4214_v53 }
 0x31d   : > { %2711 = vmatprep.subr.bf16.mxu1 %v4219_v54  ;;  %v4223_v54 = vld [vmem:[%s5606_s11 + $0xd0] ss:$8 sps:$4 sm:$0xff]  }
 0x320   : > { %2712 = vmatpush1.bf16.msra.mxu1 %v4217_v6 }
 0x321   : > { %2713 = vmatprep.subr.bf16.mxu1 %v4222_v12 }
 0x324   : > { %2714 = vmatpush1.bf16.msra.mxu1 %v4220_v30 }
 0x325   : > { %2715 = vmatprep.subr.bf16.mxu1 %v4225_v32 }
 0x328   : > { %2716 = vmatpush1.bf16.msra.mxu1 %v4223_v54 }
 0x38a   : > { %v1801_v56 = vpop.f32.mrb[40].mxu1 }
 0x38b   : > { %v1803_v58 = vpop.f32.mrb[41].mxu1 }
 0x38c   : > { %v1805_v61 = vpop.f32.mrb[42].mxu1 }
 0x38d   : > { %v1898_v10 = vpack.c.bf16 %v1805_v61, %v1801_v56  ;;  %v1807_v20 = vpop.f32.mrb[43].mxu1 }
 0x38e   : > { %v1899_v23 = vpack.c.bf16 %v1807_v20, %v1803_v58 }
 0x38f   : > { %v1956_v24 = vadd.bf16 %v5115_v60, %v1898_v10 }
 0x390   : > { %v1957_v13 = vadd.bf16 %v5118_v0, %v1899_v23 }
 0x391   : > { %v1976_v31 = vadd.bf16 %v1956_v24, %v4934_v45 }
 0x392   : > { %v1977_v34 = vadd.bf16 %v1957_v13, %v4932_v43  ;;  %v1811_v42 = vpop.f32.mrb[44].mxu1 }
 0x393   : > { %v1996_v46 = vmul.bf16 1009007652, %v1976_v31  ;;  %v1813_v47 = vpop.f32.mrb[45].mxu1 }
 0x394   : > { %v1815_v50 = vpop.f32.mrb[46].mxu1  ;;  %v1997_v53 = vmul.bf16 1009007652, %v1977_v34 }
 0x395   : > { %v1900_v56 = vpack.c.bf16 %v1815_v50, %v1811_v42  ;;  %v1817_v58 = vpop.f32.mrb[47].mxu1  ;;  %v5141_v6 = vmax.bf16 %v1996_v46, %v1976_v31 }
 0x396   : > { %v1901_v45 = vpack.c.bf16 %v1817_v58, %v1813_v47  ;;  %v5139_v61 = vmax.bf16 %v1997_v53, %v1977_v34 }
 0x397   : > { %v1958_v43 = vadd.bf16 %v5115_v60, %v1900_v56 }
 0x398   : > { %v1959_v10 = vadd.bf16 %v5118_v0, %v1901_v45  ;;  %2260 = vmatprep.mubr.bf16.mxu0 %v5139_v61 }
 0x399   : > { %v1978_v20 = vadd.bf16 %v1958_v43, %v4945_v5  ;;  %2261 = vmatmul.mubr.bf16.vlgmr.msra.gmra.mrb[60].mxu0 %v5141_v6 }
 0x39a   : > { %v1979_v12 = vadd.bf16 %v1959_v10, %v4942_v1  ;;  %v1821_v23 = vpop.f32.mrb[48].mxu1 }
 0x39b   : > { %v1823_v24 = vpop.f32.mrb[49].mxu1  ;;  %v1998_v13 = vmul.bf16 1009007652, %v1978_v20 }
 0x39c   : > { %v1825_v30 = vpop.f32.mrb[50].mxu1  ;;  %v1999_v32 = vmul.bf16 1009007652, %v1979_v12 }
 0x39d   : > { %v1902_v31 = vpack.c.bf16 %v1825_v30, %v1821_v23  ;;  %v1827_v34 = vpop.f32.mrb[51].mxu1  ;;  %v5152_v50 = vmax.bf16 %v1998_v13, %v1978_v20 }
 0x39e   : > { %v1903_v42 = vpack.c.bf16 %v1827_v34, %v1823_v24  ;;  %v5149_v46 = vmax.bf16 %v1999_v32, %v1979_v12 }
 0x39f   : > { %v1960_v47 = vadd.bf16 %v5115_v60, %v1902_v31 }
 0x3a0   : > { %v1961_v5 = vadd.bf16 %v5118_v0, %v1903_v42  ;;  %2270 = vmatprep.mubr.bf16.mxu0 %v5149_v46 }
 0x3a1   : > { %v1980_v1 = vadd.bf16 %v1960_v47, %v4955_v29  ;;  %2271 = vmatmul.mubr.bf16.gmra.mrb[64].mxu0 %v5152_v50 }
 0x3a2   : > { %v1981_v53 = vadd.bf16 %v1961_v5, %v4952_v63  ;;  %v1831_v54 = vpop.f32.mrb[52].mxu1 }
 0x3a3   : > { %v1833_v56 = vpop.f32.mrb[53].mxu1  ;;  %v2000_v58 = vmul.bf16 1009007652, %v1980_v1 }
 0x3a4   : > { %v1835_v45 = vpop.f32.mrb[54].mxu1  ;;  %v2001_v43 = vmul.bf16 1009007652, %v1981_v53 }
 0x3a5   : > { %v1904_v10 = vpack.c.bf16 %v1835_v45, %v1831_v54  ;;  %v1837_v12 = vpop.f32.mrb[55].mxu1  ;;  %v5162_v13 = vmax.bf16 %v2000_v58, %v1980_v1 }
 0x3a6   : > { %v1905_v23 = vpack.c.bf16 %v1837_v12, %v1833_v56  ;;  %v5159_v20 = vmax.bf16 %v2001_v43, %v1981_v53 }
 0x3a7   : > { %v1962_v24 = vadd.bf16 %v5115_v60, %v1904_v10 }
 0x3a8   : > { %v1963_v29 = vadd.bf16 %v5118_v0, %v1905_v23  ;;  %2280 = vmatprep.mubr.bf16.mxu0 %v5159_v20 }
 0x3a9   : > { %v1982_v63 = vadd.bf16 %v1962_v24, %v4965_v51  ;;  %2281 = vmatmul.mubr.bf16.gmra.mrb[68].mxu0 %v5162_v13 }
 0x3aa   : > { %v1983_v30 = vadd.bf16 %v1963_v29, %v4962_v48  ;;  %v1841_v32 = vpop.f32.mrb[56].mxu1 }
 0x3ab   : > { %v1843_v31 = vpop.f32.mrb[57].mxu1  ;;  %v2002_v34 = vmul.bf16 1009007652, %v1982_v63 }
 0x3ac   : > { %v1845_v42 = vpop.f32.mrb[58].mxu1  ;;  %v2003_v47 = vmul.bf16 1009007652, %v1983_v30 }
 0x3ad   : > { %v1906_v5 = vpack.c.bf16 %v1845_v42, %v1841_v32  ;;  %v1847_v53 = vpop.f32.mrb[59].mxu1  ;;  %v5172_v58 = vmax.bf16 %v2002_v34, %v1982_v63 }
 0x3ae   : > { %v1907_v54 = vpack.c.bf16 %v1847_v53, %v1843_v31  ;;  %v5169_v1 = vmax.bf16 %v2003_v47, %v1983_v30 }
 0x3af   : > { %v1964_v56 = vadd.bf16 %v5115_v60, %v1906_v5 }
 0x3b0   : > { %v1965_v51 = vadd.bf16 %v5118_v0, %v1907_v54  ;;  %2290 = vmatprep.mubr.bf16.mxu0 %v5169_v1 }
 0x3b1   : > { %v1984_v48 = vadd.bf16 %v1964_v56, %v4975_v19  ;;  %2291 = vmatmul.mubr.bf16.gmra.mrb[72].mxu0 %v5172_v58 }
 0x3b2   : > { %v1985_v45 = vadd.bf16 %v1965_v51, %v4972_v15  ;;  %v1851_v43 = vpop.f32.mrb[60].mxu1 }
 0x3b3   : > { %v1853_v10 = vpop.f32.mrb[61].mxu1  ;;  %v2004_v12 = vmul.bf16 1009007652, %v1984_v48 }
 0x3b4   : > { %v1855_v23 = vpop.f32.mrb[62].mxu1  ;;  %v2005_v24 = vmul.bf16 1009007652, %v1985_v45 }
 0x3b5   : > { %v1908_v29 = vpack.c.bf16 %v1855_v23, %v1851_v43  ;;  %v1857_v30 = vpop.f32.mrb[63].mxu1  ;;  %v5182_v34 = vmax.bf16 %v2004_v12, %v1984_v48 }
 0x3b6   : > { %v1909_v32 = vpack.c.bf16 %v1857_v30, %v1853_v10  ;;  %v5179_v63 = vmax.bf16 %v2005_v24, %v1985_v45 }
 0x3b7   : > { %v1966_v31 = vadd.bf16 %v5115_v60, %v1908_v29 }
 0x3b8   : > { %v1967_v19 = vadd.bf16 %v5118_v0, %v1909_v32  ;;  %2300 = vmatprep.mubr.bf16.mxu0 %v5179_v63 }
 0x3b9   : > { %v1986_v15 = vadd.bf16 %v1966_v31, %v4985_v38  ;;  %2301 = vmatmul.mubr.bf16.gmra.mrb[76].mxu0 %v5182_v34 }
 0x3ba   : > { %v1987_v42 = vadd.bf16 %v1967_v19, %v4982_v35  ;;  %v1861_v47 = vpop.f32.mrb[64].mxu1 }
 0x3bb   : > { %v1863_v5 = vpop.f32.mrb[65].mxu1  ;;  %v2006_v53 = vmul.bf16 1009007652, %v1986_v15 }
 0x3bc   : > { %v1865_v54 = vpop.f32.mrb[66].mxu1  ;;  %v2007_v56 = vmul.bf16 1009007652, %v1987_v42 }
 0x3bd   : > { %v1910_v51 = vpack.c.bf16 %v1865_v54, %v1861_v47  ;;  %v1867_v45 = vpop.f32.mrb[67].mxu1  ;;  %v5192_v12 = vmax.bf16 %v2006_v53, %v1986_v15 }
 0x3be   : > { %v1911_v43 = vpack.c.bf16 %v1867_v45, %v1863_v5  ;;  %v5189_v48 = vmax.bf16 %v2007_v56, %v1987_v42 }
 0x3bf   : > { %v1968_v10 = vadd.bf16 %v5115_v60, %v1910_v51 }
 0x3c0   : > { %v1969_v38 = vadd.bf16 %v5118_v0, %v1911_v43  ;;  %2310 = vmatprep.mubr.bf16.mxu0 %v5189_v48 }
 0x3c1   : > { %v1988_v35 = vadd.bf16 %v1968_v10, %v4995_v7  ;;  %2311 = vmatmul.mubr.bf16.gmra.mrb[80].mxu0 %v5192_v12 }
 0x3c2   : > { %v1989_v23 = vadd.bf16 %v1969_v38, %v4992_v4  ;;  %v1871_v24 = vpop.f32.mrb[68].mxu1 }
 0x3c3   : > { %v1873_v29 = vpop.f32.mrb[69].mxu1  ;;  %v2008_v30 = vmul.bf16 1009007652, %v1988_v35 }
 0x3c4   : > { %v1875_v32 = vpop.f32.mrb[70].mxu1  ;;  %v2009_v31 = vmul.bf16 1009007652, %v1989_v23 }
 0x3c5   : > { %v1912_v19 = vpack.c.bf16 %v1875_v32, %v1871_v24  ;;  %v1877_v42 = vpop.f32.mrb[71].mxu1  ;;  %v5202_v53 = vmax.bf16 %v2008_v30, %v1988_v35 }
 0x3c6   : > { %v1913_v47 = vpack.c.bf16 %v1877_v42, %v1873_v29  ;;  %v5199_v15 = vmax.bf16 %v2009_v31, %v1989_v23 }
 0x3c7   : > { %v1970_v5 = vadd.bf16 %v5115_v60, %v1912_v19 }
 0x3c8   : > { %v1971_v7 = vadd.bf16 %v5118_v0, %v1913_v47  ;;  %2320 = vmatprep.mubr.bf16.mxu0 %v5199_v15 }
 0x3c9   : > { %v1990_v4 = vadd.bf16 %v1970_v5, %v5005_v37  ;;  %2321 = vmatmul.mubr.bf16.gmra.mrb[84].mxu0 %v5202_v53 }
 0x3ca   : > { %v1991_v54 = vadd.bf16 %v1971_v7, %v5002_v33  ;;  %v1881_v56 = vpop.f32.mrb[72].mxu1 }
 0x3cb   : > { %v1883_v51 = vpop.f32.mrb[73].mxu1  ;;  %v2010_v45 = vmul.bf16 1009007652, %v1990_v4 }
 0x3cc   : > { %v1885_v43 = vpop.f32.mrb[74].mxu1  ;;  %v2011_v10 = vmul.bf16 1009007652, %v1991_v54 }
 0x3cd   : > { %v1914_v38 = vpack.c.bf16 %v1885_v43, %v1881_v56  ;;  %v1887_v23 = vpop.f32.mrb[75].mxu1  ;;  %v5212_v30 = vmax.bf16 %v2010_v45, %v1990_v4 }
 0x3ce   : > { %v1915_v24 = vpack.c.bf16 %v1887_v23, %v1883_v51  ;;  %v5209_v35 = vmax.bf16 %v2011_v10, %v1991_v54 }
 0x3cf   : > { %v1972_v29 = vadd.bf16 %v5115_v60, %v1914_v38 }
 0x3d0   : > { %v1973_v37 = vadd.bf16 %v5118_v0, %v1915_v24  ;;  %2330 = vmatprep.mubr.bf16.mxu0 %v5209_v35  ;;  %v4229_v24 = vld [vmem:[%s5606_s11 + $0xf0] ss:$8 sps:$4 sm:$0xff]  }
 0x3d1   : > { %v1992_v33 = vadd.bf16 %v1972_v29, %v5017_v9  ;;  %2331 = vmatmul.mubr.bf16.gmra.mrb[88].mxu0 %v5212_v30  ;;  %v4232_v29 = vld [vmem:[%s5608_s13 + $0x40] sm:$0xff]  }
 0x3d2   : > { %v1993_v32 = vadd.bf16 %v1973_v37, %v5014_v18  ;;  %v1891_v31 = vpop.f32.mrb[76].mxu1  ;;  %v4233_v37 = vld [vmem:[%s5608_s13] sm:$0xff]   ;;  %3877 = vmatprep.subr.bf16.mxu0 %v4232_v29 }
 0x3d3   : > { %v1916_v19 = vpack.c.bf16 %v1891_v31, %v1891_v31  ;;  %v1893_v42 = vpop.f32.mrb[77].mxu1  ;;  %v2012_v47 = vmul.bf16 1009007652, %v1992_v33  ;;  %3878 = vmatpush3.bf16.msra.mxu0 %v4233_v37  ;;  %v4236_v31 = vld [vmem:[%s5608_s13 + $0x50] sm:$0xff]  }
 0x3d4   : > { %v1917_v5 = vpack.c.bf16 %v1893_v42, %v1893_v42  ;;  %v1895_v7 = vpop.f32.mrb[78].mxu1  ;;  %v2013_v54 = vmul.bf16 1009007652, %v1993_v32  ;;  %v4238_v42 = vld [vmem:[%s5608_s13 + $0x58] sm:$0xff]  }
 0x3d5   : > { %v1974_v4 = vadd.bf16 %v5115_v60, %v1916_v19  ;;  %v1896_v56 = vpop.f32.mrb[79].mxu1  ;;  %v5224_v43 = vmax.bf16 %v2012_v47, %v1992_v33  ;;  %v4234_v33 = vld [vmem:[%s5608_s13 + $0x48] sm:$0xff]   ;;  %v4237_v19 = vld [vmem:[%s5608_s13 + $0x10] sm:$0xff]   ;;  %v4239_v47 = vld [vmem:[%s5608_s13 + $0x18] sm:$0xff]  }
 0x3d6   : > { %v1975_v51 = vadd.bf16 %v5118_v0, %v1917_v5  ;;  %v5221_v45 = vmax.bf16 %v2013_v54, %v1993_v32  ;;  %v4231_v0 = vld [vmem:[%s5606_s11 + $0xf4] ss:$8 sps:$4 sm:$0xff]   ;;  %v4235_v32 = vld [vmem:[%s5608_s13 + $0x8] sm:$0xff]   ;;  %3879 = vmatprep.subr.bf16.mxu0 %v4234_v33  ;;  %v4240_v5 = vld [vmem:[%s5608_s13 + $0x60] sm:$0xff]  }
 0x3d7   : > { %v1994_v9 = vadd.bf16 %v1974_v4, %v5025_v8  ;;  %v4228_v8 = vld [vmem:[%s5606_s11 + $0xe4] ss:$8 sps:$4 sm:$0xff]   ;;  %3880 = vmatpush3.bf16.msra.mxu0 %v4235_v32  ;;  %v4244_v56 = vld [vmem:[%s5608_s13 + $0x70] sm:$0xff]  }
 0x3d8   : > { %v1995_v18 = vadd.bf16 %v1975_v51, %v5022_v28  ;;  %2340 = vmatprep.mubr.bf16.mxu0 %v5221_v45  ;;  %v4226_v28 = vld [vmem:[%s5606_s11 + $0xe0] ss:$8 sps:$4 sm:$0xff]   ;;  %2717 = vmatprep.subr.bf16.mxu1 %v4228_v8  ;;  %v4245_v51 = vld [vmem:[%s5608_s13 + $0x30] sm:$0xff]  }
 0x3d9   : > { %2341 = vmatmul.mubr.bf16.gmra.mrb[92].mxu0 %v5224_v43  ;;  %v2014_v38 = vmul.bf16 1009007652, %v1994_v9  ;;  %2718 = vmatpush1.bf16.msra.mxu1 %v4226_v28  ;;  %v4241_v7 = vld [vmem:[%s5608_s13 + $0x20] sm:$0xff]   ;;  %v4242_v54 = vld [vmem:[%s5608_s13 + $0x68] sm:$0xff]  }
 0x3da   : > { %v2015_v10 = vmul.bf16 1009007652, %v1995_v18  ;;  %2719 = vmatprep.subr.bf16.mxu1 %v4231_v0  ;;  %3881 = vmatprep.subr.bf16.mxu0 %v4236_v31  ;;  %v4243_v4 = vld [vmem:[%s5608_s13 + $0x28] sm:$0xff]  }
 0x3db   : > { %v5232_v60 = vmax.bf16 %v2014_v38, %v1994_v9  ;;  %3882 = vmatpush3.bf16.msra.mxu0 %v4237_v19  ;;  %v3779_v9 = vld.sshfl [vmem:[%s5605_s10] sm:$0x11 pattern:$0x75316420] }
 0x3dc   : > { %v5229_v23 = vmax.bf16 %v2015_v10, %v1995_v18  ;;  %3883 = vmatprep.subr.bf16.mxu0 %v4238_v42  ;;  %v2388_v18 = vcombine.high %v3779_v9, %v3779_v9  ;;  %v2395_v10 = vrot.slane %v3779_v9, %v4699_v57 }
 0x3dd   : > { %2720 = vmatpush1.bf16.msra.mxu1 %v4229_v24 }
 0x3de   : > { %2350 = vmatprep.mubr.bf16.mxu0 %v5229_v23  ;;  %v2402_v38 = vrot.slane %v2388_v18, %v4699_v57  ;;  %v2404_v8 = vpack.i.b16 %v2395_v10, %v2395_v10 }
 0x3df   : > { %3884 = vmatpush3.bf16.msra.mxu0 %v4239_v47 }
 0x3e0   : > { %3885 = vmatprep.subr.bf16.mxu0 %v4240_v5  ;;  %v2411_v28 = vpack.i.b16 %v2402_v38, %v2402_v38  ;;  %v5295_v29 = vrot.slane %v2404_v8, %v4715_v3 }
 0x3e1   : > { %2351 = vmatmul.mubr.bf16.gmra.mrb[96].mxu0 %v5232_v60 }
 0x3e2   : > { %v5298_v33 = vrot.slane %v2411_v28, %v4715_v3 }
 0x3e3   : > { %3886 = vmatpush3.bf16.msra.mxu0 %v4241_v7 }
 0x3e4   : > { %3887 = vmatprep.subr.bf16.mxu0 %v4242_v54 }
 0x3e7   : > { %3888 = vmatpush3.bf16.msra.mxu0 %v4243_v4 }
 0x3e8   : > { %3889 = vmatprep.subr.bf16.mxu0 %v4244_v56 }
 0x3eb   : > { %3890 = vmatpush3.bf16.msra.mxu0 %v4245_v51 }
 0x46c   : > { %v2262_v0 = vpop.f32.mrb[60].mxu0 }
 0x46d   : > { %v2264_v24 = vpop.f32.mrb[61].mxu0 }
 0x46e   : > { %v2266_v37 = vpop.f32.mrb[62].mxu0 }
 0x46f   : > { %v2359_v32 = vpack.c.bf16 %v2266_v37, %v2262_v0  ;;  %v2268_v31 = vpop.f32.mrb[63].mxu0 }
 0x470   : > { %v2360_v19 = vpack.c.bf16 %v2268_v31, %v2264_v24 }
 0x471   : > { %v2417_v42 = vadd.bf16 %v5295_v29, %v2359_v32 }
 0x472   : > { %v2418_v47 = vadd.bf16 %v5298_v33, %v2360_v19 }
 0x473   : > { %v2437_v5 = vadd.bf16 %v2417_v42, %v5141_v6 }
 0x474   : > { %v2438_v7 = vadd.bf16 %v2418_v47, %v5139_v61  ;;  %v2272_v54 = vpop.f32.mrb[64].mxu0 }
 0x475   : > { %v2457_v4 = vmul.bf16 1009007652, %v2437_v5  ;;  %v2274_v56 = vpop.f32.mrb[65].mxu0 }
 0x476   : > { %v2276_v51 = vpop.f32.mrb[66].mxu0  ;;  %v2458_v9 = vmul.bf16 1009007652, %v2438_v7 }
 0x477   : > { %v2361_v18 = vpack.c.bf16 %v2276_v51, %v2272_v54  ;;  %v2278_v10 = vpop.f32.mrb[67].mxu0  ;;  %v5306_v28 = vmax.bf16 %v2457_v4, %v2437_v5 }
 0x478   : > { %v2362_v38 = vpack.c.bf16 %v2278_v10, %v2274_v56  ;;  %v5304_v8 = vmax.bf16 %v2458_v9, %v2438_v7 }
 0x479   : > { %v2419_v0 = vadd.bf16 %v5295_v29, %v2361_v18 }
 0x47a   : > { %v2420_v24 = vadd.bf16 %v5298_v33, %v2362_v38  ;;  %2721 = vmatprep.mubr.bf16.mxu1 %v5304_v8 }
 0x47b   : > { %v2439_v61 = vadd.bf16 %v2419_v0, %v5152_v50  ;;  %2722 = vmatmul.mubr.bf16.vlgmr.msra.gmra.mrb[80].mxu1 %v5306_v28 }
 0x47c   : > { %v2440_v6 = vadd.bf16 %v2420_v24, %v5149_v46  ;;  %v2282_v37 = vpop.f32.mrb[68].mxu0 }
 0x47d   : > { %v2284_v32 = vpop.f32.mrb[69].mxu0  ;;  %v2459_v31 = vmul.bf16 1009007652, %v2439_v61 }
 0x47e   : > { %v2286_v19 = vpop.f32.mrb[70].mxu0  ;;  %v2460_v42 = vmul.bf16 1009007652, %v2440_v6 }
 0x47f   : > { %v2363_v47 = vpack.c.bf16 %v2286_v19, %v2282_v37  ;;  %v2288_v5 = vpop.f32.mrb[71].mxu0  ;;  %v5317_v56 = vmax.bf16 %v2459_v31, %v2439_v61 }
 0x480   : > { %v2364_v7 = vpack.c.bf16 %v2288_v5, %v2284_v32  ;;  %v5314_v54 = vmax.bf16 %v2460_v42, %v2440_v6 }
 0x481   : > { %v2421_v4 = vadd.bf16 %v5295_v29, %v2363_v47 }
 0x482   : > { %v2422_v50 = vadd.bf16 %v5298_v33, %v2364_v7  ;;  %2731 = vmatprep.mubr.bf16.mxu1 %v5314_v54 }
 0x483   : > { %v2441_v46 = vadd.bf16 %v2421_v4, %v5162_v13  ;;  %2732 = vmatmul.mubr.bf16.gmra.mrb[84].mxu1 %v5317_v56 }
 0x484   : > { %v2442_v51 = vadd.bf16 %v2422_v50, %v5159_v20  ;;  %v2292_v9 = vpop.f32.mrb[72].mxu0 }
 0x485   : > { %v2294_v18 = vpop.f32.mrb[73].mxu0  ;;  %v2461_v10 = vmul.bf16 1009007652, %v2441_v46 }
 0x486   : > { %v2296_v38 = vpop.f32.mrb[74].mxu0  ;;  %v2462_v0 = vmul.bf16 1009007652, %v2442_v51 }
 0x487   : > { %v2365_v24 = vpack.c.bf16 %v2296_v38, %v2292_v9  ;;  %v2298_v6 = vpop.f32.mrb[75].mxu0  ;;  %v5327_v31 = vmax.bf16 %v2461_v10, %v2441_v46 }
 0x488   : > { %v2366_v37 = vpack.c.bf16 %v2298_v6, %v2294_v18  ;;  %v5324_v61 = vmax.bf16 %v2462_v0, %v2442_v51 }
 0x489   : > { %v2423_v32 = vadd.bf16 %v5295_v29, %v2365_v24 }
 0x48a   : > { %v2424_v13 = vadd.bf16 %v5298_v33, %v2366_v37  ;;  %2741 = vmatprep.mubr.bf16.mxu1 %v5324_v61 }
 0x48b   : > { %v2443_v20 = vadd.bf16 %v2423_v32, %v5172_v58  ;;  %2742 = vmatmul.mubr.bf16.gmra.mrb[88].mxu1 %v5327_v31 }
 0x48c   : > { %v2444_v19 = vadd.bf16 %v2424_v13, %v5169_v1  ;;  %v2302_v42 = vpop.f32.mrb[76].mxu0 }
 0x48d   : > { %v2304_v47 = vpop.f32.mrb[77].mxu0  ;;  %v2463_v5 = vmul.bf16 1009007652, %v2443_v20 }
 0x48e   : > { %v2306_v7 = vpop.f32.mrb[78].mxu0  ;;  %v2464_v4 = vmul.bf16 1009007652, %v2444_v19 }
 0x48f   : > { %v2367_v50 = vpack.c.bf16 %v2306_v7, %v2302_v42  ;;  %v2308_v51 = vpop.f32.mrb[79].mxu0  ;;  %v5337_v10 = vmax.bf16 %v2463_v5, %v2443_v20 }
 0x490   : > { %v2368_v9 = vpack.c.bf16 %v2308_v51, %v2304_v47  ;;  %v5334_v46 = vmax.bf16 %v2464_v4, %v2444_v19 }
 0x491   : > { %v2425_v18 = vadd.bf16 %v5295_v29, %v2367_v50 }
 0x492   : > { %v2426_v58 = vadd.bf16 %v5298_v33, %v2368_v9  ;;  %2751 = vmatprep.mubr.bf16.mxu1 %v5334_v46 }
 0x493   : > { %v2445_v1 = vadd.bf16 %v2425_v18, %v5182_v34  ;;  %2752 = vmatmul.mubr.bf16.gmra.mrb[92].mxu1 %v5337_v10 }
 0x494   : > { %v2446_v38 = vadd.bf16 %v2426_v58, %v5179_v63  ;;  %v2312_v0 = vpop.f32.mrb[80].mxu0 }
 0x495   : > { %v2314_v24 = vpop.f32.mrb[81].mxu0  ;;  %v2465_v6 = vmul.bf16 1009007652, %v2445_v1 }
 0x496   : > { %v2316_v37 = vpop.f32.mrb[82].mxu0  ;;  %v2466_v32 = vmul.bf16 1009007652, %v2446_v38 }
 0x497   : > { %v2369_v13 = vpack.c.bf16 %v2316_v37, %v2312_v0  ;;  %v2318_v19 = vpop.f32.mrb[83].mxu0  ;;  %v5347_v5 = vmax.bf16 %v2465_v6, %v2445_v1 }
 0x498   : > { %v2370_v42 = vpack.c.bf16 %v2318_v19, %v2314_v24  ;;  %v5344_v20 = vmax.bf16 %v2466_v32, %v2446_v38 }
 0x499   : > { %v2427_v47 = vadd.bf16 %v5295_v29, %v2369_v13 }
 0x49a   : > { %v2428_v34 = vadd.bf16 %v5298_v33, %v2370_v42  ;;  %2761 = vmatprep.mubr.bf16.mxu1 %v5344_v20 }
 0x49b   : > { %v2447_v63 = vadd.bf16 %v2427_v47, %v5192_v12  ;;  %2762 = vmatmul.mubr.bf16.gmra.mrb[96].mxu1 %v5347_v5 }
 0x49c   : > { %v2448_v7 = vadd.bf16 %v2428_v34, %v5189_v48  ;;  %v2322_v4 = vpop.f32.mrb[84].mxu0 }
 0x49d   : > { %v2324_v50 = vpop.f32.mrb[85].mxu0  ;;  %v2467_v51 = vmul.bf16 1009007652, %v2447_v63 }
 0x49e   : > { %v2326_v9 = vpop.f32.mrb[86].mxu0  ;;  %v2468_v18 = vmul.bf16 1009007652, %v2448_v7 }
 0x49f   : > { %v2371_v58 = vpack.c.bf16 %v2326_v9, %v2322_v4  ;;  %v2328_v38 = vpop.f32.mrb[87].mxu0  ;;  %v5357_v6 = vmax.bf16 %v2467_v51, %v2447_v63 }
 0x4a0   : > { %v2372_v0 = vpack.c.bf16 %v2328_v38, %v2324_v50  ;;  %v5354_v1 = vmax.bf16 %v2468_v18, %v2448_v7 }
 0x4a1   : > { %v2429_v24 = vadd.bf16 %v5295_v29, %v2371_v58 }
 0x4a2   : > { %v2430_v12 = vadd.bf16 %v5298_v33, %v2372_v0  ;;  %2771 = vmatprep.mubr.bf16.mxu1 %v5354_v1 }
 0x4a3   : > { %v2449_v48 = vadd.bf16 %v2429_v24, %v5202_v53  ;;  %2772 = vmatmul.mubr.bf16.gmra.mrb[100].mxu1 %v5357_v6 }
 0x4a4   : > { %v2450_v37 = vadd.bf16 %v2430_v12, %v5199_v15  ;;  %v2332_v32 = vpop.f32.mrb[88].mxu0 }
 0x4a5   : > { %v2334_v13 = vpop.f32.mrb[89].mxu0  ;;  %v2469_v19 = vmul.bf16 1009007652, %v2449_v48 }
 0x4a6   : > { %v2336_v42 = vpop.f32.mrb[90].mxu0  ;;  %v2470_v47 = vmul.bf16 1009007652, %v2450_v37 }
 0x4a7   : > { %v2373_v34 = vpack.c.bf16 %v2336_v42, %v2332_v32  ;;  %v2338_v7 = vpop.f32.mrb[91].mxu0  ;;  %v5367_v51 = vmax.bf16 %v2469_v19, %v2449_v48 }
 0x4a8   : > { %v2374_v4 = vpack.c.bf16 %v2338_v7, %v2334_v13  ;;  %v5364_v63 = vmax.bf16 %v2470_v47, %v2450_v37 }
 0x4a9   : > { %v2431_v50 = vadd.bf16 %v5295_v29, %v2373_v34 }
 0x4aa   : > { %v2432_v53 = vadd.bf16 %v5298_v33, %v2374_v4  ;;  %2781 = vmatprep.mubr.bf16.mxu1 %v5364_v63 }
 0x4ab   : > { %v2451_v15 = vadd.bf16 %v2431_v50, %v5212_v30  ;;  %2782 = vmatmul.mubr.bf16.gmra.mrb[104].mxu1 %v5367_v51 }
 0x4ac   : > { %v2452_v9 = vadd.bf16 %v2432_v53, %v5209_v35  ;;  %v2342_v18 = vpop.f32.mrb[92].mxu0 }
 0x4ad   : > { %v2344_v58 = vpop.f32.mrb[93].mxu0  ;;  %v2471_v38 = vmul.bf16 1009007652, %v2451_v15 }
 0x4ae   : > { %v2346_v0 = vpop.f32.mrb[94].mxu0  ;;  %v2472_v24 = vmul.bf16 1009007652, %v2452_v9 }
 0x4af   : > { %v2375_v12 = vpack.c.bf16 %v2346_v0, %v2342_v18  ;;  %v2348_v37 = vpop.f32.mrb[95].mxu0  ;;  %v5377_v19 = vmax.bf16 %v2471_v38, %v2451_v15 }
 0x4b0   : > { %v2376_v32 = vpack.c.bf16 %v2348_v37, %v2344_v58  ;;  %v5374_v48 = vmax.bf16 %v2472_v24, %v2452_v9 }
 0x4b1   : > { %v2433_v13 = vadd.bf16 %v5295_v29, %v2375_v12 }
 0x4b2   : > { %v2434_v30 = vadd.bf16 %v5298_v33, %v2376_v32  ;;  %2791 = vmatprep.mubr.bf16.mxu1 %v5374_v48  ;;  %v4249_v32 = vld [vmem:[%s5610_s15 + $0x8] sm:$0xff]  }
 0x4b3   : > { %v2453_v35 = vadd.bf16 %v2433_v13, %v5224_v43  ;;  %2792 = vmatmul.mubr.bf16.gmra.mrb[108].mxu1 %v5377_v19  ;;  %v3812_v13 = vld.sshfl [vmem:[%s5607_s12] sm:$0x11 pattern:$0x75316420] }
 0x4b4   : > { %v2454_v42 = vadd.bf16 %v2434_v30, %v5221_v45  ;;  %v2352_v47 = vpop.f32.mrb[96].mxu0  ;;  %v2849_v30 = vcombine.high %v3812_v13, %v3812_v13 }
 0x4b5   : > { %v2377_v34 = vpack.c.bf16 %v2352_v47, %v2352_v47  ;;  %v2354_v7 = vpop.f32.mrb[97].mxu0  ;;  %v2473_v4 = vmul.bf16 1009007652, %v2453_v35 }
 0x4b6   : > { %v2378_v50 = vpack.c.bf16 %v2354_v7, %v2354_v7  ;;  %v2356_v53 = vpop.f32.mrb[98].mxu0  ;;  %v2474_v9 = vmul.bf16 1009007652, %v2454_v42 }
 0x4b7   : > { %v2435_v15 = vadd.bf16 %v5295_v29, %v2377_v34  ;;  %v2357_v18 = vpop.f32.mrb[99].mxu0  ;;  %v5389_v0 = vmax.bf16 %v2473_v4, %v2453_v35  ;;  %v2856_v35 = vrot.slane %v3812_v13, %v4699_v57 }
 0x4b8   : > { %v2436_v58 = vadd.bf16 %v5298_v33, %v2378_v50  ;;  %v5386_v38 = vmax.bf16 %v2474_v9, %v2454_v42  ;;  %v4248_v33 = vld [vmem:[%s5610_s15] sm:$0xff]   ;;  %v2863_v42 = vrot.slane %v2849_v30, %v4699_v57 }
 0x4b9   : > { %v2455_v43 = vadd.bf16 %v2435_v15, %v5232_v60  ;;  %v4246_v60 = vld [vmem:[%s5608_s13 + $0x78] sm:$0xff]   ;;  %3989 = vmatprep.subr.bf16.mxu1 %v4248_v33  ;;  %v2865_v47 = vpack.i.b16 %v2856_v35, %v2856_v35 }
 0x4ba   : > { %v2456_v45 = vadd.bf16 %v2436_v58, %v5229_v23  ;;  %2801 = vmatprep.mubr.bf16.mxu1 %v5386_v38  ;;  %v4247_v23 = vld [vmem:[%s5608_s13 + $0x38] sm:$0xff]   ;;  %3891 = vmatprep.subr.bf16.mxu0 %v4246_v60  ;;  %v2872_v34 = vpack.i.b16 %v2863_v42, %v2863_v42 }
 0x4bb   : > { %2802 = vmatmul.mubr.bf16.gmra.mrb[112].mxu1 %v5389_v0  ;;  %v2475_v12 = vmul.bf16 1009007652, %v2455_v43  ;;  %3892 = vmatpush3.bf16.msra.mxu0 %v4247_v23  ;;  %v5418_v50 = vrot.slane %v2865_v47, %v4715_v3 }
 0x4bc   : > { %v2476_v24 = vmul.bf16 1009007652, %v2456_v45  ;;  %3990 = vmatpush3.bf16.msra.mxu1 %v4248_v33  ;;  %v5421_v9 = vrot.slane %v2872_v34, %v4715_v3 }
 0x4bd   : > { %v5397_v29 = vmax.bf16 %v2475_v12, %v2455_v43  ;;  %3991 = vmatprep.subr.bf16.mxu1 %v4249_v32 }
 0x4be   : > { %v5394_v37 = vmax.bf16 %v2476_v24, %v2456_v45 }
 0x4c0   : > { %2811 = vmatprep.mubr.bf16.mxu1 %v5394_v37  ;;  %3992 = vmatpush3.bf16.msra.mxu1 %v4249_v32 }
 0x4c3   : > { %2812 = vmatmul.mubr.bf16.gmra.mrb[116].mxu1 %v5397_v29 }
 0x54e   : > { %v2723_v7 = vpop.f32.mrb[80].mxu1 }
 0x54f   : > { %v2725_v4 = vpop.f32.mrb[81].mxu1 }
 0x550   : > { %v2727_v53 = vpop.f32.mrb[82].mxu1 }
 0x551   : > { %v2820_v15 = vpack.c.bf16 %v2727_v53, %v2723_v7  ;;  %v2729_v18 = vpop.f32.mrb[83].mxu1 }
 0x552   : > { %v2821_v58 = vpack.c.bf16 %v2729_v18, %v2725_v4 }
 0x553   : > { %v2878_v43 = vadd.bf16 %v5418_v50, %v2820_v15 }
 0x554   : > { %v2879_v45 = vadd.bf16 %v5421_v9, %v2821_v58 }
 0x555   : > { %v2898_v57 = vadd.bf16 %v2878_v43, %v5306_v28 }
 0x556   : > { %v2899_v24 = vadd.bf16 %v2879_v45, %v5304_v8  ;;  %v2733_v12 = vpop.f32.mrb[84].mxu1 }
 0x557   : > { %v2918_v60 = vmul.bf16 1009007652, %v2898_v57  ;;  %v2735_v23 = vpop.f32.mrb[85].mxu1 }
 0x558   : > { %v2919_v33 = vmul.bf16 1009007652, %v2899_v24  ;;  %v2737_v32 = vpop.f32.mrb[86].mxu1 }
 0x559   : > { %v2938_v13 = vmax.bf16 %v2918_v60, %v2898_v57  ;;  %v2822_v30 = vpack.c.bf16 %v2737_v32, %v2733_v12  ;;  %v2739_v3 = vpop.f32.mrb[87].mxu1 }
 0x55a   : > { %v2823_v35 = vpack.c.bf16 %v2739_v3, %v2735_v23  ;;  %v2939_v42 = vmax.bf16 %v2919_v33, %v2899_v24 }
 0x55b   : > { %v2880_v47 = vadd.bf16 %v5418_v50, %v2822_v30  ;;  %v2958_v28 = vadd.bf16 %v2938_v13, %v4745_v26 }
 0x55c   : > { %v2881_v34 = vadd.bf16 %v5421_v9, %v2823_v35  ;;  %v2959_v7 = vadd.bf16 %v2939_v42, %v4743_v25 }
 0x55d   : > { %v2900_v8 = vadd.bf16 %v2880_v47, %v5317_v56 }
 0x55e   : > { %v2901_v4 = vadd.bf16 %v2881_v34, %v5314_v54  ;;  %v2743_v53 = vpop.f32.mrb[88].mxu1  ;;  %3145 = vmatprep.mubr.bf16.mxu0 %v2959_v7 }
 0x55f   : > { %v2920_v15 = vmul.bf16 1009007652, %v2900_v8  ;;  %v2745_v18 = vpop.f32.mrb[89].mxu1  ;;  %3146 = vmatmul.mubr.bf16.vlgmr.msra.gmra.mrb[100].mxu0 %v2958_v28 }
 0x560   : > { %v2921_v58 = vmul.bf16 1009007652, %v2901_v4  ;;  %v2747_v43 = vpop.f32.mrb[90].mxu1 }
 0x561   : > { %v2824_v45 = vpack.c.bf16 %v2747_v43, %v2743_v53  ;;  %v2749_v57 = vpop.f32.mrb[91].mxu1  ;;  %v2940_v24 = vmax.bf16 %v2920_v15, %v2900_v8 }
 0x562   : > { %v2825_v12 = vpack.c.bf16 %v2749_v57, %v2745_v18  ;;  %v2941_v60 = vmax.bf16 %v2921_v58, %v2901_v4 }
 0x563   : > { %v2882_v25 = vadd.bf16 %v5418_v50, %v2824_v45  ;;  %v2960_v23 = vadd.bf16 %v2940_v24, %v4753_v40 }
 0x564   : > { %v2883_v26 = vadd.bf16 %v5421_v9, %v2825_v12  ;;  %v2961_v56 = vadd.bf16 %v2941_v60, %v4751_v36 }
 0x565   : > { %v2902_v54 = vadd.bf16 %v2882_v25, %v5327_v31 }
 0x566   : > { %v2903_v33 = vadd.bf16 %v2883_v26, %v5324_v61  ;;  %v2753_v32 = vpop.f32.mrb[92].mxu1  ;;  %3153 = vmatprep.mubr.bf16.mxu0 %v2961_v56 }
 0x567   : > { %v2922_v13 = vmul.bf16 1009007652, %v2902_v54  ;;  %v2755_v30 = vpop.f32.mrb[93].mxu1  ;;  %3154 = vmatmul.mubr.bf16.gmra.mrb[104].mxu0 %v2960_v23 }
 0x568   : > { %v2923_v3 = vmul.bf16 1009007652, %v2903_v33  ;;  %v2757_v35 = vpop.f32.mrb[94].mxu1 }
 0x569   : > { %v2826_v42 = vpack.c.bf16 %v2757_v35, %v2753_v32  ;;  %v2759_v47 = vpop.f32.mrb[95].mxu1  ;;  %v2942_v34 = vmax.bf16 %v2922_v13, %v2902_v54 }
 0x56a   : > { %v2827_v7 = vpack.c.bf16 %v2759_v47, %v2755_v30  ;;  %v2943_v28 = vmax.bf16 %v2923_v3, %v2903_v33 }
 0x56b   : > { %v2884_v36 = vadd.bf16 %v5418_v50, %v2826_v42  ;;  %v2962_v8 = vadd.bf16 %v2942_v34, %v4761_v52 }
 0x56c   : > { %v2885_v31 = vadd.bf16 %v5421_v9, %v2827_v7  ;;  %v2963_v40 = vadd.bf16 %v2943_v28, %v4759_v49 }
 0x56d   : > { %v2904_v61 = vadd.bf16 %v2884_v36, %v5337_v10 }
 0x56e   : > { %v2905_v4 = vadd.bf16 %v2885_v31, %v5334_v46  ;;  %v2763_v53 = vpop.f32.mrb[96].mxu1  ;;  %3161 = vmatprep.mubr.bf16.mxu0 %v2963_v40 }
 0x56f   : > { %v2924_v15 = vmul.bf16 1009007652, %v2904_v61  ;;  %v2765_v18 = vpop.f32.mrb[97].mxu1  ;;  %3162 = vmatmul.mubr.bf16.gmra.mrb[108].mxu0 %v2962_v8 }
 0x570   : > { %v2925_v58 = vmul.bf16 1009007652, %v2905_v4  ;;  %v2767_v43 = vpop.f32.mrb[98].mxu1 }
 0x571   : > { %v2828_v45 = vpack.c.bf16 %v2767_v43, %v2763_v53  ;;  %v2769_v57 = vpop.f32.mrb[99].mxu1  ;;  %v2944_v24 = vmax.bf16 %v2924_v15, %v2904_v61 }
 0x572   : > { %v2829_v12 = vpack.c.bf16 %v2769_v57, %v2765_v18  ;;  %v2945_v60 = vmax.bf16 %v2925_v58, %v2905_v4 }
 0x573   : > { %v2886_v49 = vadd.bf16 %v5418_v50, %v2828_v45  ;;  %v2964_v25 = vadd.bf16 %v2944_v24, %v4769_v2 }
 0x574   : > { %v2887_v10 = vadd.bf16 %v5421_v9, %v2829_v12  ;;  %v2965_v52 = vadd.bf16 %v2945_v60, %v4767_v62 }
 0x575   : > { %v2906_v46 = vadd.bf16 %v2886_v49, %v5347_v5 }
 0x576   : > { %v2907_v26 = vadd.bf16 %v2887_v10, %v5344_v20  ;;  %v2773_v56 = vpop.f32.mrb[100].mxu1  ;;  %3169 = vmatprep.mubr.bf16.mxu0 %v2965_v52 }
 0x577   : > { %v2926_v54 = vmul.bf16 1009007652, %v2906_v46  ;;  %v2775_v23 = vpop.f32.mrb[101].mxu1  ;;  %3170 = vmatmul.mubr.bf16.gmra.mrb[112].mxu0 %v2964_v25 }
 0x578   : > { %v2927_v33 = vmul.bf16 1009007652, %v2907_v26  ;;  %v2777_v32 = vpop.f32.mrb[102].mxu1 }
 0x579   : > { %v2830_v13 = vpack.c.bf16 %v2777_v32, %v2773_v56  ;;  %v2779_v30 = vpop.f32.mrb[103].mxu1  ;;  %v2946_v3 = vmax.bf16 %v2926_v54, %v2906_v46 }
 0x57a   : > { %v2831_v35 = vpack.c.bf16 %v2779_v30, %v2775_v23  ;;  %v2947_v42 = vmax.bf16 %v2927_v33, %v2907_v26 }
 0x57b   : > { %v2888_v62 = vadd.bf16 %v5418_v50, %v2830_v13  ;;  %v2966_v47 = vadd.bf16 %v2946_v3, %v4777_v17 }
 0x57c   : > { %v2889_v5 = vadd.bf16 %v5421_v9, %v2831_v35  ;;  %v2967_v2 = vadd.bf16 %v2947_v42, %v4775_v14 }
 0x57d   : > { %v2908_v20 = vadd.bf16 %v2888_v62, %v5357_v6 }
 0x57e   : > { %v2909_v34 = vadd.bf16 %v2889_v5, %v5354_v1  ;;  %v2783_v7 = vpop.f32.mrb[104].mxu1  ;;  %3177 = vmatprep.mubr.bf16.mxu0 %v2967_v2 }
 0x57f   : > { %v2928_v28 = vmul.bf16 1009007652, %v2908_v20  ;;  %v2785_v36 = vpop.f32.mrb[105].mxu1  ;;  %3178 = vmatmul.mubr.bf16.gmra.mrb[116].mxu0 %v2966_v47 }
 0x580   : > { %v2929_v31 = vmul.bf16 1009007652, %v2909_v34  ;;  %v2787_v40 = vpop.f32.mrb[106].mxu1 }
 0x581   : > { %v2832_v61 = vpack.c.bf16 %v2787_v40, %v2783_v7  ;;  %v2789_v8 = vpop.f32.mrb[107].mxu1  ;;  %v2948_v4 = vmax.bf16 %v2928_v28, %v2908_v20 }
 0x582   : > { %v2833_v53 = vpack.c.bf16 %v2789_v8, %v2785_v36  ;;  %v2949_v15 = vmax.bf16 %v2929_v31, %v2909_v34 }
 0x583   : > { %v2890_v14 = vadd.bf16 %v5418_v50, %v2832_v61  ;;  %v2968_v18 = vadd.bf16 %v2948_v4, %v4785_v39 }
 0x584   : > { %v2891_v6 = vadd.bf16 %v5421_v9, %v2833_v53  ;;  %v2969_v17 = vadd.bf16 %v2949_v15, %v4783_v27 }
 0x585   : > { %v2910_v1 = vadd.bf16 %v2890_v14, %v5367_v51 }
 0x586   : > { %v2911_v58 = vadd.bf16 %v2891_v6, %v5364_v63  ;;  %v2793_v43 = vpop.f32.mrb[108].mxu1  ;;  %3185 = vmatprep.mubr.bf16.mxu0 %v2969_v17 }
 0x587   : > { %v2930_v45 = vmul.bf16 1009007652, %v2910_v1  ;;  %v2795_v57 = vpop.f32.mrb[109].mxu1  ;;  %3186 = vmatmul.mubr.bf16.gmra.mrb[120].mxu0 %v2968_v18 }
 0x588   : > { %v2931_v24 = vmul.bf16 1009007652, %v2911_v58  ;;  %v2797_v12 = vpop.f32.mrb[110].mxu1 }
 0x589   : > { %v2834_v60 = vpack.c.bf16 %v2797_v12, %v2793_v43  ;;  %v2799_v49 = vpop.f32.mrb[111].mxu1  ;;  %v2950_v10 = vmax.bf16 %v2930_v45, %v2910_v1 }
 0x58a   : > { %v2835_v52 = vpack.c.bf16 %v2799_v49, %v2795_v57  ;;  %v2951_v46 = vmax.bf16 %v2931_v24, %v2911_v58 }
 0x58b   : > { %v2892_v27 = vadd.bf16 %v5418_v50, %v2834_v60  ;;  %v2970_v25 = vadd.bf16 %v2950_v10, %v4793_v44 }
 0x58c   : > { %v2893_v51 = vadd.bf16 %v5421_v9, %v2835_v52  ;;  %v2971_v39 = vadd.bf16 %v2951_v46, %v4791_v41 }
 0x58d   : > { %v2912_v63 = vadd.bf16 %v2892_v27, %v5377_v19 }
 0x58e   : > { %v2913_v26 = vadd.bf16 %v2893_v51, %v5374_v48  ;;  %v2803_v56 = vpop.f32.mrb[112].mxu1  ;;  %3193 = vmatprep.mubr.bf16.mxu0 %v2971_v39 }
 0x58f   : > { %v2932_v54 = vmul.bf16 1009007652, %v2912_v63  ;;  %v2805_v23 = vpop.f32.mrb[113].mxu1  ;;  %3194 = vmatmul.mubr.bf16.gmra.mrb[124].mxu0 %v2970_v25 }
 0x590   : > { %v2933_v33 = vmul.bf16 1009007652, %v2913_v26  ;;  %v2807_v32 = vpop.f32.mrb[114].mxu1 }
 0x591   : > { %v2836_v13 = vpack.c.bf16 %v2807_v32, %v2803_v56  ;;  %v2809_v30 = vpop.f32.mrb[115].mxu1  ;;  %v2952_v3 = vmax.bf16 %v2932_v54, %v2912_v63 }
 0x592   : > { %v2837_v35 = vpack.c.bf16 %v2809_v30, %v2805_v23  ;;  %v2953_v42 = vmax.bf16 %v2933_v33, %v2913_v26 }
 0x593   : > { %v2894_v41 = vadd.bf16 %v5418_v50, %v2836_v13  ;;  %v2972_v62 = vadd.bf16 %v2952_v3, %v4801_v59 }
 0x594   : > { %v2895_v19 = vadd.bf16 %v5421_v9, %v2837_v35  ;;  %v2973_v44 = vadd.bf16 %v2953_v42, %v4799_v55 }
 0x595   : > { %v2914_v48 = vadd.bf16 %v2894_v41, %v5389_v0 }
 0x596   : > { %v2915_v5 = vadd.bf16 %v2895_v19, %v5386_v38  ;;  %v2813_v2 = vpop.f32.mrb[116].mxu1  ;;  %3201 = vmatprep.mubr.bf16.mxu0 %v2973_v44 }
 0x597   : > { %v2934_v20 = vmul.bf16 1009007652, %v2914_v48  ;;  %v2838_v47 = vpack.c.bf16 %v2813_v2, %v2813_v2  ;;  %v2815_v34 = vpop.f32.mrb[117].mxu1  ;;  %3202 = vmatmul.mubr.bf16.gmra.mrb[128].mxu0 %v2972_v62 }
 0x598   : > { %v2935_v7 = vmul.bf16 1009007652, %v2915_v5  ;;  %v2839_v28 = vpack.c.bf16 %v2815_v34, %v2815_v34  ;;  %v2817_v36 = vpop.f32.mrb[118].mxu1 }
 0x599   : > { %v2896_v31 = vadd.bf16 %v5418_v50, %v2838_v47  ;;  %v2818_v40 = vpop.f32.mrb[119].mxu1  ;;  %v2954_v61 = vmax.bf16 %v2934_v20, %v2914_v48 }
 0x59a   : > { %v2897_v55 = vadd.bf16 %v5421_v9, %v2839_v28  ;;  %v2955_v0 = vmax.bf16 %v2935_v7, %v2915_v5 }
 0x59b   : > { %v2916_v59 = vadd.bf16 %v2896_v31, %v5397_v29  ;;  %v2974_v53 = vadd.bf16 %v2954_v61, %v4810_v16 }
 0x59c   : > { %v2917_v38 = vadd.bf16 %v2897_v55, %v5394_v37  ;;  %v2975_v8 = vadd.bf16 %v2955_v0, %v4807_v11  ;;  %v4250_v37 = vld [vmem:[%s5610_s15 + $0x10] sm:$0xff]   ;;  %v4251_v11 = vld [vmem:[%s5610_s15 + $0x18] sm:$0xff]  }
 0x59d   : > { %v2936_v4 = vmul.bf16 1009007652, %v2916_v59  ;;  %3993 = vmatprep.subr.bf16.mxu1 %v4250_v37 }
 0x59e   : > { %v2937_v15 = vmul.bf16 1009007652, %v2917_v38  ;;  %3209 = vmatprep.mubr.bf16.mxu0 %v2975_v8  ;;  %3994 = vmatpush3.bf16.msra.mxu1 %v4250_v37 }
 0x59f   : > { %3210 = vmatmul.mubr.bf16.gmra.mrb[132].mxu0 %v2974_v53  ;;  %v2956_v6 = vmax.bf16 %v2936_v4, %v2916_v59  ;;  %3995 = vmatprep.subr.bf16.mxu1 %v4251_v11 }
 0x5a0   : > { %v2957_v14 = vmax.bf16 %v2937_v15, %v2917_v38 }
 0x5a1   : > { %v2976_v9 = vadd.bf16 %v2956_v6, %v4818_v22 }
 0x5a2   : > { %v2977_v50 = vadd.bf16 %v2957_v14, %v4815_v21  ;;  %3996 = vmatpush3.bf16.msra.mxu1 %v4251_v11  ;;  %v5492_v21 = vld [vmem:[%s5609_s14] ss:$0 sm:$0xff] }
 0x5a4   : > { %3217 = vmatprep.mubr.bf16.mxu0 %v2977_v50 }
 0x5a7   : > { %3218 = vmatmul.mubr.bf16.gmra.mrb[136].mxu0 %v2976_v9 }
 0x632   : > { %v3893_v16 = vpop.f32.mrb[100].mxu0 }
 0x633   : > { %v3894_v22 = vpop.f32.mrb[101].mxu0 }
 0x634   : > { %v3895_v29 = vadd.f32 %v3894_v22, %v3893_v16  ;;  %v3896_v17 = vpop.f32.mrb[102].mxu0 }
 0x635   : > { %v3897_v1 = vpop.f32.mrb[103].mxu0 }
 0x636   : > { %v3148_v18 = vadd.f32 %v3895_v29, %v5492_v21  ;;  %v3898_v58 = vadd.f32 %v3897_v1, %v3896_v17 }
 0x638   : > { %v3225_v43 = vmul.f32 0.01, %v3148_v18  ;;  %v3151_v45 = vadd.f32 %v3898_v58, %v5492_v21 }
 0x63a   : > { %v3226_v57 = vmul.f32 0.01, %v3151_v45  ;;  %v3899_v24 = vpop.f32.mrb[104].mxu0  ;;  %v3244_v60 = vmax.f32 %v3148_v18, %v3225_v43 }
 0x63b   : > { %v3900_v12 = vpop.f32.mrb[105].mxu0 }
 0x63c   : > { %v3245_v49 = vmax.f32 %v3151_v45, %v3226_v57  ;;  %v3901_v10 = vadd.f32 %v3900_v12, %v3899_v24  ;;  %v3902_v52 = vpop.f32.mrb[106].mxu0 }
 0x63d   : > { %v3903_v46 = vpop.f32.mrb[107].mxu0 }
 0x63e   : > { %v3263_v27 = vpack.c.bf16 %v3245_v49, %v3244_v60  ;;  %v3156_v51 = vadd.f32 %v3901_v10, %v5492_v21  ;;  %v3904_v39 = vadd.f32 %v3903_v46, %v3902_v52 }
 0x640   : > { %v3227_v63 = vmul.f32 0.01, %v3156_v51  ;;  %v3159_v25 = vadd.f32 %v3904_v39, %v5492_v21  ;;  %3997 = vmatprep.mubr.msk.bf16.mxu1 %vm834_vm2, %v3263_v27 }
 0x642   : > { %v3228_v26 = vmul.f32 0.01, %v3159_v25  ;;  %v3905_v56 = vpop.f32.mrb[108].mxu0  ;;  %v3246_v23 = vmax.f32 %v3156_v51, %v3227_v63 }
 0x643   : > { %v3906_v54 = vpop.f32.mrb[109].mxu0 }
 0x644   : > { %v3247_v33 = vmax.f32 %v3159_v25, %v3228_v26  ;;  %v3907_v32 = vadd.f32 %v3906_v54, %v3905_v56  ;;  %v3908_v13 = vpop.f32.mrb[110].mxu0 }
 0x645   : > { %v3909_v30 = vpop.f32.mrb[111].mxu0 }
 0x646   : > { %v3264_v3 = vpack.c.bf16 %v3247_v33, %v3246_v23  ;;  %v3164_v35 = vadd.f32 %v3907_v32, %v5492_v21  ;;  %v3910_v42 = vadd.f32 %v3909_v30, %v3908_v13 }
 0x648   : > { %v3229_v41 = vmul.f32 0.01, %v3164_v35  ;;  %v3167_v19 = vadd.f32 %v3910_v42, %v5492_v21  ;;  %3998 = vmatmul.mubr.msk.bf16.vlgmr.msra.gmra.mrb[120].mxu1 %vm834_vm2, %v3264_v3 }
 0x64a   : > { %v3230_v44 = vmul.f32 0.01, %v3167_v19  ;;  %v3911_v48 = vpop.f32.mrb[112].mxu0  ;;  %v3248_v5 = vmax.f32 %v3164_v35, %v3229_v41 }
 0x64b   : > { %v3912_v62 = vpop.f32.mrb[113].mxu0 }
 0x64c   : > { %v3249_v2 = vmax.f32 %v3167_v19, %v3230_v44  ;;  %v3913_v20 = vadd.f32 %v3912_v62, %v3911_v48  ;;  %v3914_v47 = vpop.f32.mrb[114].mxu0 }
 0x64d   : > { %v3915_v34 = vpop.f32.mrb[115].mxu0 }
 0x64e   : > { %v3265_v7 = vpack.c.bf16 %v3249_v2, %v3248_v5  ;;  %v3172_v28 = vadd.f32 %v3913_v20, %v5492_v21  ;;  %v3916_v36 = vadd.f32 %v3915_v34, %v3914_v47 }
 0x650   : > { %v3231_v31 = vmul.f32 0.01, %v3172_v28  ;;  %v3175_v40 = vadd.f32 %v3916_v36, %v5492_v21  ;;  %4001 = vmatprep.mubr.msk.bf16.mxu1 %vm834_vm2, %v3265_v7 }
 0x652   : > { %v3232_v61 = vmul.f32 0.01, %v3175_v40  ;;  %v3917_v55 = vpop.f32.mrb[116].mxu0  ;;  %v3250_v59 = vmax.f32 %v3172_v28, %v3231_v31 }
 0x653   : > { %v3918_v0 = vpop.f32.mrb[117].mxu0 }
 0x654   : > { %v3251_v38 = vmax.f32 %v3175_v40, %v3232_v61  ;;  %v3919_v8 = vadd.f32 %v3918_v0, %v3917_v55  ;;  %v3920_v4 = vpop.f32.mrb[118].mxu0 }
 0x655   : > { %v3921_v53 = vpop.f32.mrb[119].mxu0 }
 0x656   : > { %v3266_v15 = vpack.c.bf16 %v3251_v38, %v3250_v59  ;;  %v3180_v14 = vadd.f32 %v3919_v8, %v5492_v21  ;;  %v3922_v6 = vadd.f32 %v3921_v53, %v3920_v4 }
 0x658   : > { %v3233_v50 = vmul.f32 0.01, %v3180_v14  ;;  %v3183_v9 = vadd.f32 %v3922_v6, %v5492_v21  ;;  %4002 = vmatmul.mubr.msk.bf16.gmra.mrb[124].mxu1 %vm834_vm2, %v3266_v15 }
 0x65a   : > { %v3234_v37 = vmul.f32 0.01, %v3183_v9  ;;  %v3923_v11 = vpop.f32.mrb[120].mxu0  ;;  %v3252_v22 = vmax.f32 %v3180_v14, %v3233_v50 }
 0x65b   : > { %v3924_v16 = vpop.f32.mrb[121].mxu0 }
 0x65c   : > { %v3253_v29 = vmax.f32 %v3183_v9, %v3234_v37  ;;  %v3925_v17 = vadd.f32 %v3924_v16, %v3923_v11  ;;  %v3926_v1 = vpop.f32.mrb[122].mxu0  ;;  %v5526_v16 = vld [vmem:[%s5611_s16] ss:$0 sm:$0xff] }
 0x65d   : > { %v3927_v18 = vpop.f32.mrb[123].mxu0 }
 0x65e   : > { %v3267_v58 = vpack.c.bf16 %v3253_v29, %v3252_v22  ;;  %v3188_v43 = vadd.f32 %v3925_v17, %v5492_v21  ;;  %v3928_v45 = vadd.f32 %v3927_v18, %v3926_v1 }
 0x660   : > { %v3235_v57 = vmul.f32 0.01, %v3188_v43  ;;  %v3191_v24 = vadd.f32 %v3928_v45, %v5492_v21  ;;  %4005 = vmatprep.mubr.msk.bf16.mxu1 %vm834_vm2, %v3267_v58 }
 0x662   : > { %v3236_v12 = vmul.f32 0.01, %v3191_v24  ;;  %v3929_v60 = vpop.f32.mrb[124].mxu0  ;;  %v3254_v10 = vmax.f32 %v3188_v43, %v3235_v57 }
 0x663   : > { %v3930_v49 = vpop.f32.mrb[125].mxu0 }
 0x664   : > { %v3255_v52 = vmax.f32 %v3191_v24, %v3236_v12  ;;  %v3931_v46 = vadd.f32 %v3930_v49, %v3929_v60  ;;  %v3932_v27 = vpop.f32.mrb[126].mxu0 }
 0x665   : > { %v3933_v51 = vpop.f32.mrb[127].mxu0 }
 0x666   : > { %v3268_v39 = vpack.c.bf16 %v3255_v52, %v3254_v10  ;;  %v3196_v63 = vadd.f32 %v3931_v46, %v5492_v21  ;;  %v3934_v25 = vadd.f32 %v3933_v51, %v3932_v27 }
 0x668   : > { %v3237_v26 = vmul.f32 0.01, %v3196_v63  ;;  %v3199_v56 = vadd.f32 %v3934_v25, %v5492_v21  ;;  %4006 = vmatmul.mubr.msk.bf16.gmra.mrb[128].mxu1 %vm834_vm2, %v3268_v39 }
 0x66a   : > { %v3238_v54 = vmul.f32 0.01, %v3199_v56  ;;  %v3935_v23 = vpop.f32.mrb[128].mxu0  ;;  %v3256_v32 = vmax.f32 %v3196_v63, %v3237_v26 }
 0x66b   : > { %v3936_v33 = vpop.f32.mrb[129].mxu0 }
 0x66c   : > { %v3257_v13 = vmax.f32 %v3199_v56, %v3238_v54  ;;  %v3937_v30 = vadd.f32 %v3936_v33, %v3935_v23  ;;  %v3938_v3 = vpop.f32.mrb[130].mxu0 }
 0x66d   : > { %v3939_v35 = vpop.f32.mrb[131].mxu0 }
 0x66e   : > { %v3269_v42 = vpack.c.bf16 %v3257_v13, %v3256_v32  ;;  %v3204_v41 = vadd.f32 %v3937_v30, %v5492_v21  ;;  %v3940_v19 = vadd.f32 %v3939_v35, %v3938_v3 }
 0x670   : > { %v3239_v44 = vmul.f32 0.01, %v3204_v41  ;;  %v3207_v48 = vadd.f32 %v3940_v19, %v5492_v21  ;;  %4009 = vmatprep.mubr.msk.bf16.mxu1 %vm834_vm2, %v3269_v42 }
 0x672   : > { %v3240_v62 = vmul.f32 0.01, %v3207_v48  ;;  %v3941_v5 = vpop.f32.mrb[132].mxu0  ;;  %v3258_v20 = vmax.f32 %v3204_v41, %v3239_v44 }
 0x673   : > { %v3942_v2 = vpop.f32.mrb[133].mxu0 }
 0x674   : > { %v3259_v47 = vmax.f32 %v3207_v48, %v3240_v62  ;;  %v3943_v34 = vadd.f32 %v3942_v2, %v3941_v5  ;;  %v3944_v7 = vpop.f32.mrb[134].mxu0 }
 0x675   : > { %v3945_v28 = vpop.f32.mrb[135].mxu0 }
 0x676   : > { %v3270_v36 = vpack.c.bf16 %v3259_v47, %v3258_v20  ;;  %v3212_v31 = vadd.f32 %v3943_v34, %v5492_v21  ;;  %v3946_v40 = vadd.f32 %v3945_v28, %v3944_v7 }
 0x678   : > { %v3241_v61 = vmul.f32 0.01, %v3212_v31  ;;  %v3215_v55 = vadd.f32 %v3946_v40, %v5492_v21  ;;  %4010 = vmatmul.mubr.msk.bf16.gmra.mrb[132].mxu1 %vm834_vm2, %v3270_v36 }
 0x67a   : > { %v3242_v0 = vmul.f32 0.01, %v3215_v55  ;;  %v3947_v59 = vpop.f32.mrb[136].mxu0  ;;  %v3260_v8 = vmax.f32 %v3212_v31, %v3241_v61 }
 0x67b   : > { %v3948_v38 = vpop.f32.mrb[137].mxu0 }
 0x67c   : > { %v3261_v4 = vmax.f32 %v3215_v55, %v3242_v0  ;;  %v3949_v53 = vadd.f32 %v3948_v38, %v3947_v59  ;;  %v3950_v15 = vpop.f32.mrb[138].mxu0 }
 0x67d   : > { %v3951_v14 = vpop.f32.mrb[139].mxu0 }
 0x67e   : > { %v3271_v6 = vpack.c.bf16 %v3261_v4, %v3260_v8  ;;  %v3220_v50 = vadd.f32 %v3949_v53, %v5492_v21 }
 0x680   : > { %v3243_v9 = vmul.f32 0.01, %v3220_v50  ;;  %4013 = vmatprep.mubr.msk.bf16.mxu1 %vm834_vm2, %v3271_v6 }
 0x682   : > { %v3262_v37 = vmax.f32 %v3220_v50, %v3243_v9 }
 0x684   : > { %v3272_v11 = vpack.c.bf16 %v3262_v37, %v3262_v37 }
 0x686   : > { %4014 = vmatmul.mubr.msk.bf16.gmra.mrb[136].mxu1 %vm834_vm2, %v3272_v11 }
 0x71b   : > { %v3999_v22 = vpop.f32.mrb[120].mxu1 }
 0x71c   : > { %v3385_v29 = vadd.f32 %v3999_v22, %v5526_v16  ;;  %v3376_v17 = vpop.f32.mrb[121].mxu1 }
 0x71d   : > { %v3377_v1 = vadd.f32 %v5526_v16, %v3376_v17  ;;  %v4000_v18 = vpop.f32.mrb[122].mxu1 }
 0x71e   : > { %v3847_v21 = vmul.f32 -1.442695, %v3385_v29  ;;  %v3388_v58 = vadd.f32 %v4000_v18, %v5526_v16  ;;  %v3379_v43 = vpop.f32.mrb[123].mxu1 }
 0x71f   : > { %v3845_v45 = vmul.f32 -1.442695, %v3377_v1  ;;  %v3380_v57 = vadd.f32 %v5526_v16, %v3379_v43 }
 0x720   : > { %4252 = vpow2.f32 %v3847_v21  ;;  %v3848_v24 = vmul.f32 -1.442695, %v3388_v58 }
 0x721   : > { %4254 = vpow2.f32 %v3845_v45  ;;  %v3846_v12 = vmul.f32 -1.442695, %v3380_v57 }
 0x722   : > { %4256 = vpow2.f32 %v3848_v24 }
 0x723   : > { %4258 = vpow2.f32 %v3846_v12 }
 0x72a   : > { %v4253_v60 = vpop.eup %4252 }
 0x72b   : > { %v4255_v49 = vpop.eup %4254  ;;  %v3513_v10 = vadd.f32 1.0, %v4253_v60  ;;  %v4003_v52 = vpop.f32.mrb[124].mxu1 }
 0x72c   : > { %v4257_v46 = vpop.eup %4256  ;;  %v3511_v27 = vadd.f32 1.0, %v4255_v49  ;;  %v3401_v51 = vadd.f32 %v4003_v52, %v5526_v16  ;;  %v3392_v39 = vpop.f32.mrb[125].mxu1 }
 0x72d   : > { %v4259_v63 = vpop.eup %4258  ;;  %4260 = vrcp.f32 %v3513_v10  ;;  %v3514_v25 = vadd.f32 1.0, %v4257_v46  ;;  %v3393_v26 = vadd.f32 %v5526_v16, %v3392_v39  ;;  %v4004_v56 = vpop.f32.mrb[126].mxu1 }
 0x72e   : > { %4262 = vrcp.f32 %v3511_v27  ;;  %v3512_v54 = vadd.f32 1.0, %v4259_v63  ;;  %v3851_v23 = vmul.f32 -1.442695, %v3401_v51  ;;  %v3404_v33 = vadd.f32 %v4004_v56, %v5526_v16  ;;  %v3395_v32 = vpop.f32.mrb[127].mxu1 }
 0x72f   : > { %4264 = vrcp.f32 %v3514_v25  ;;  %v3849_v13 = vmul.f32 -1.442695, %v3393_v26  ;;  %v3396_v30 = vadd.f32 %v5526_v16, %v3395_v32 }
 0x730   : > { %4266 = vrcp.f32 %v3512_v54  ;;  %v3852_v3 = vmul.f32 -1.442695, %v3404_v33 }
 0x731   : > { %4268 = vpow2.f32 %v3851_v23  ;;  %v3850_v35 = vmul.f32 -1.442695, %v3396_v30 }
 0x732   : > { %4270 = vpow2.f32 %v3849_v13 }
 0x733   : > { %4272 = vpow2.f32 %v3852_v3 }
 0x734   : > { %4274 = vpow2.f32 %v3850_v35 }
 0x737   : > { %v4261_v42 = vpop.eup %4260 }
 0x738   : > { %v4263_v41 = vpop.eup %4262  ;;  %3571 = vst.msk [vmem:[%s5541_s27 + $0x10] sm:$0xff] %vm3568_vm3, %v4261_v42 }
 0x739   : > { %v4265_v19 = vpop.eup %4264  ;;  %3569 = vst.msk [vmem:[%s5541_s27] sm:$0xff] %vm3568_vm3, %v4263_v41 }
 0x73a   : > { %v4267_v44 = vpop.eup %4266  ;;  %3572 = vst.msk [vmem:[%s5541_s27 + $0x18] sm:$0xff] %vm3568_vm3, %v4265_v19 }
 0x73b   : > { %v4269_v48 = vpop.eup %4268  ;;  %3570 = vst.msk [vmem:[%s5541_s27 + $0x8] sm:$0xff] %vm3568_vm3, %v4267_v44  ;;  %v4007_v62 = vpop.f32.mrb[128].mxu1 }
 0x73c   : > { %v4271_v5 = vpop.eup %4270  ;;  %v3517_v2 = vadd.f32 1.0, %v4269_v48  ;;  %v3417_v20 = vadd.f32 %v4007_v62, %v5526_v16  ;;  %v3408_v47 = vpop.f32.mrb[129].mxu1 }
 0x73d   : > { %v4273_v34 = vpop.eup %4272  ;;  %v3515_v7 = vadd.f32 1.0, %v4271_v5  ;;  %v3409_v28 = vadd.f32 %v5526_v16, %v3408_v47  ;;  %v4008_v36 = vpop.f32.mrb[130].mxu1 }
 0x73e   : > { %v4275_v31 = vpop.eup %4274  ;;  %4276 = vrcp.f32 %v3517_v2  ;;  %v3518_v40 = vadd.f32 1.0, %v4273_v34  ;;  %v3855_v61 = vmul.f32 -1.442695, %v3417_v20  ;;  %v3420_v55 = vadd.f32 %v4008_v36, %v5526_v16  ;;  %v3411_v0 = vpop.f32.mrb[131].mxu1 }
 0x73f   : > { %4278 = vrcp.f32 %v3515_v7  ;;  %v3516_v59 = vadd.f32 1.0, %v4275_v31  ;;  %v3853_v38 = vmul.f32 -1.442695, %v3409_v28  ;;  %v3412_v8 = vadd.f32 %v5526_v16, %v3411_v0 }
 0x740   : > { %4280 = vrcp.f32 %v3518_v40  ;;  %v3856_v4 = vmul.f32 -1.442695, %v3420_v55 }
 0x741   : > { %4282 = vrcp.f32 %v3516_v59  ;;  %v3854_v53 = vmul.f32 -1.442695, %v3412_v8 }
 0x742   : > { %4284 = vpow2.f32 %v3855_v61 }
 0x743   : > { %4286 = vpow2.f32 %v3853_v38 }
 0x744   : > { %4288 = vpow2.f32 %v3856_v4 }
 0x745   : > { %4290 = vpow2.f32 %v3854_v53 }
 0x748   : > { %v4277_v15 = vpop.eup %4276 }
 0x749   : > { %v4279_v14 = vpop.eup %4278  ;;  %3575 = vst.msk [vmem:[%s5541_s27 + $0x30] sm:$0xff] %vm3568_vm3, %v4277_v15 }
 0x74a   : > { %v4281_v6 = vpop.eup %4280  ;;  %3573 = vst.msk [vmem:[%s5541_s27 + $0x20] sm:$0xff] %vm3568_vm3, %v4279_v14 }
 0x74b   : > { %v4283_v50 = vpop.eup %4282  ;;  %3576 = vst.msk [vmem:[%s5541_s27 + $0x38] sm:$0xff] %vm3568_vm3, %v4281_v6  ;;  %v4011_v9 = vpop.f32.mrb[132].mxu1 }
 0x74c   : > { %v4285_v37 = vpop.eup %4284  ;;  %3574 = vst.msk [vmem:[%s5541_s27 + $0x28] sm:$0xff] %vm3568_vm3, %v4283_v50  ;;  %v3433_v11 = vadd.f32 %v4011_v9, %v5526_v16  ;;  %v3424_v22 = vpop.f32.mrb[133].mxu1 }
 0x74d   : > { %v4287_v29 = vpop.eup %4286  ;;  %v3521_v17 = vadd.f32 1.0, %v4285_v37  ;;  %v3425_v1 = vadd.f32 %v5526_v16, %v3424_v22  ;;  %v4012_v18 = vpop.f32.mrb[134].mxu1 }
 0x74e   : > { %v4289_v21 = vpop.eup %4288  ;;  %v3519_v58 = vadd.f32 1.0, %v4287_v29  ;;  %v3436_v43 = vadd.f32 %v4012_v18, %v5526_v16  ;;  %v3427_v45 = vpop.f32.mrb[135].mxu1  ;;  %v3859_v12 = vmul.f32 -1.442695, %v3433_v11 }
 0x74f   : > { %v4291_v57 = vpop.eup %4290  ;;  %4292 = vrcp.f32 %v3521_v17  ;;  %v3522_v24 = vadd.f32 1.0, %v4289_v21  ;;  %v3428_v60 = vadd.f32 %v5526_v16, %v3427_v45  ;;  %v3857_v10 = vmul.f32 -1.442695, %v3425_v1 }
 0x750   : > { %4294 = vrcp.f32 %v3519_v58  ;;  %v3520_v49 = vadd.f32 1.0, %v4291_v57  ;;  %v3860_v52 = vmul.f32 -1.442695, %v3436_v43 }
 0x751   : > { %4296 = vrcp.f32 %v3522_v24  ;;  %v3858_v46 = vmul.f32 -1.442695, %v3428_v60 }
 0x752   : > { %4298 = vrcp.f32 %v3520_v49 }
 0x753   : > { %4300 = vpow2.f32 %v3859_v12 }
 0x754   : > { %4302 = vpow2.f32 %v3857_v10 }
 0x755   : > { %4304 = vpow2.f32 %v3860_v52 }
 0x756   : > { %4306 = vpow2.f32 %v3858_v46 }
 0x759   : > { %v4293_v27 = vpop.eup %4292  ;;  %v4015_v51 = vpop.f32.mrb[136].mxu1 }
 0x75a   : > { %v4295_v39 = vpop.eup %4294  ;;  %3579 = vst.msk [vmem:[%s5541_s27 + $0x50] sm:$0xff] %vm3568_vm3, %v4293_v27  ;;  %v3449_v63 = vadd.f32 %v4015_v51, %v5526_v16  ;;  %v3440_v25 = vpop.f32.mrb[137].mxu1 }
 0x75b   : > { %v4297_v26 = vpop.eup %4296  ;;  %3577 = vst.msk [vmem:[%s5541_s27 + $0x40] sm:$0xff] %vm3568_vm3, %v4295_v39  ;;  %v3441_v56 = vadd.f32 %v5526_v16, %v3440_v25  ;;  %v4016_v54 = vpop.f32.mrb[138].mxu1 }
 0x75c   : > { %v4299_v23 = vpop.eup %4298  ;;  %3580 = vst.msk [vmem:[%s5541_s27 + $0x58] sm:$0xff] %vm3568_vm3, %v4297_v26  ;;  %v3863_v33 = vmul.f32 -1.442695, %v3449_v63  ;;  %v3443_v32 = vpop.f32.mrb[139].mxu1 }
 0x75d   : > { %v4301_v13 = vpop.eup %4300  ;;  %3578 = vst.msk [vmem:[%s5541_s27 + $0x48] sm:$0xff] %vm3568_vm3, %v4299_v23  ;;  %v3861_v30 = vmul.f32 -1.442695, %v3441_v56  ;;  %v3444_v3 = vadd.f32 %v5526_v16, %v3443_v32 }
 0x75e   : > { %v4303_v35 = vpop.eup %4302  ;;  %v3525_v42 = vadd.f32 1.0, %v4301_v13  ;;  %4308 = vpow2.f32 %v3863_v33 }
 0x75f   : > { %v4305_v41 = vpop.eup %4304  ;;  %v3523_v19 = vadd.f32 1.0, %v4303_v35  ;;  %4310 = vpow2.f32 %v3861_v30  ;;  %v3862_v62 = vmul.f32 -1.442695, %v3444_v3 }
 0x760   : > { %v4307_v44 = vpop.eup %4306  ;;  %4312 = vrcp.f32 %v3525_v42  ;;  %v3526_v48 = vadd.f32 1.0, %v4305_v41 }
 0x761   : > { %4314 = vrcp.f32 %v3523_v19  ;;  %v3524_v5 = vadd.f32 1.0, %v4307_v44 }
 0x762   : > { %4316 = vrcp.f32 %v3526_v48 }
 0x763   : > { %4318 = vrcp.f32 %v3524_v5 }
 0x764   : > { %4320 = vpow2.f32 %v3862_v62 }
 0x768   : > { %v4309_v16 = vpop.eup %4308 }
 0x769   : > { %v4311_v2 = vpop.eup %4310  ;;  %v3529_v20 = vadd.f32 1.0, %v4309_v16 }
 0x76a   : > { %v4313_v47 = vpop.eup %4312  ;;  %v3527_v34 = vadd.f32 1.0, %v4311_v2 }
 0x76b   : > { %v4315_v7 = vpop.eup %4314  ;;  %3583 = vst.msk [vmem:[%s5541_s27 + $0x70] sm:$0xff] %vm3568_vm3, %v4313_v47  ;;  %4322 = vrcp.f32 %v3529_v20 }
 0x76c   : > { %v4317_v28 = vpop.eup %4316  ;;  %3581 = vst.msk [vmem:[%s5541_s27 + $0x60] sm:$0xff] %vm3568_vm3, %v4315_v7  ;;  %4324 = vrcp.f32 %v3527_v34 }
 0x76d   : > { %v4319_v36 = vpop.eup %4318  ;;  %3584 = vst.msk [vmem:[%s5541_s27 + $0x78] sm:$0xff] %vm3568_vm3, %v4317_v28 }
 0x76e   : > { %v4321_v31 = vpop.eup %4320  ;;  %3582 = vst.msk [vmem:[%s5541_s27 + $0x68] sm:$0xff] %vm3568_vm3, %v4319_v36 }
 0x76f   : > { %v3528_v40 = vadd.f32 1.0, %v4321_v31 }
 0x771   : > { %4326 = vrcp.f32 %v3528_v40 }
 0x775   : > { %v4323_v61 = vpop.eup %4322 }
 0x776   : > { %v4325_v55 = vpop.eup %4324  ;;  %3587 = vst.msk [vmem:[%s5541_s27 + $0x90] sm:$0xff] %vm3568_vm3, %v4323_v61 }
 0x777   : > { %3585 = vst.msk [vmem:[%s5541_s27 + $0x80] sm:$0xff] %vm3568_vm3, %v4325_v55 }
 0x77b   : > { %v4327_v0 = vpop.eup %4326 }
 0x77c   : > { %3586 = vst.msk [vmem:[%s5541_s27 + $0x88] sm:$0xff] %vm3568_vm3, %v4327_v0 }
 0x77d PF: > { %s27_s24 = sadd.s32 1, %s4334_s24  }
 0x77e   : > { %p24_p4 = scmp.ge.s32.totalorder %s27_s24, 4  }
 0x780   :  { %26 = sbr.rel (!%p24_p4) target bundleno = 3 (0x3), region = 118 }

</bundles_post_ra>
